<compile_context>
chip_gen: v7x
topology: tpu7x:2x2x1
jax: 0.10.0
libtpu: 0.0.40
codegen_flags: <defaults>
</compile_context>

<pallas_src>
import functools

import jax
import jax.numpy as jnp
from jax.experimental import pallas as pl
from jax.experimental.pallas import tpu as pltpu


# --------------------------------------------------------------------------- #
# utilities
# --------------------------------------------------------------------------- #
def _round_up(x, m):
    return ((x + m - 1) // m) * m


def _chip_config():
    """Per-generation knobs: smaller i-tiles + tighter VMEM cap on v7x (64 MiB/TC)."""
    cap = 64 * 1024 * 1024                       # conservative default (v7x per-TC)
    try:
        info = pltpu.get_tpu_info()
        cap = int(getattr(info, "vmem_capacity_bytes", cap) or cap)
    except Exception:
        pass
    small_vmem = cap <= 80 * 1024 * 1024          # v7x
    ti_target = 64 if small_vmem else 128         # halve pairwise intermediates on v7x
    vmem_limit = max(32 * 1024 * 1024,
                     min(int(cap * 3 // 4), 96 * 1024 * 1024))
    return ti_target, vmem_limit


def _pick_tile(n, target, align):
    """Largest tile <= target that divides n and respects `align`, else n (full)."""
    if n <= target:
        return n
    t = (min(n, target) // align) * align
    while t >= align:
        if n % t == 0:
            return t
        t -= align
    return n


def _pick_rows_tile(rows, target=256):
    if rows <= target:
        return rows
    t = (target // 8) * 8
    while t >= 8:
        if rows % t == 0:
            return t
        t -= 8
    return rows


def _pick_batch_block(B, n_pad, ni):
    """Fold batch into pairwise tiles for small graphs; prefer an even parallel extent."""
    bblk = 1
    if n_pad < 128:
        bblk = max(1, min(B, 128 // max(n_pad, 1)))
        while B % bblk:
            bblk -= 1

    def par(bb):
        return (B // bb) * ni

    # v7x has two TensorCores: keep the parallel grid extent >= 2 and even when possible.
    while bblk > 1 and (par(bblk) < 2 or par(bblk) % 2 != 0):
        bblk -= 1
        while B % bblk:
            bblk -= 1
    return bblk


# --------------------------------------------------------------------------- #
# phase 1: per-node projections (h, A, Bm) -- once per layer
# --------------------------------------------------------------------------- #
def _gat_proj_kernel(x_ref, w_ref, b_ref, w1a_ref, w1b_ref, b1_ref,
                     h_ref, a_ref, bm_ref):
    cdt = w_ref.dtype
    x = x_ref[...].astype(cdt)
    h = jnp.dot(x, w_ref[...], preferred_element_type=jnp.float32) + b_ref[...]
    h_ref[...] = h.astype(h_ref.dtype)            # value matrix (cdt)
    hc = h.astype(cdt)
    # b1 folded into A: one less add per pairwise element downstream.
    a_ref[...] = jnp.dot(hc, w1a_ref[...],
                         preferred_element_type=jnp.float32) + b1_ref[...]
    bm_ref[...] = jnp.dot(hc, w1b_ref[...], preferred_element_type=jnp.float32)


# --------------------------------------------------------------------------- #
# phase 2: pairwise attention with online masked softmax over j-blocks
# --------------------------------------------------------------------------- #
def _gat_pairwise_kernel(a_ref, bm_ref, hv_ref, adj_ref, w2_ref, b2_ref,
                         out_ref, m_sc, l_sc, acc_sc, *, h_on_sublanes):
    kj = pl.program_id(2)
    nj = pl.num_programs(2)

    @pl.when(kj == 0)
    def _init():
        m_sc[...] = jnp.full_like(m_sc, -jnp.inf)
        l_sc[...] = jnp.zeros_like(l_sc)
        acc_sc[...] = jnp.zeros_like(acc_sc)

    a = a_ref[...]                                        # (bblk, ti, H) f32
    if h_on_sublanes:
        # bm_ref: (bblk, H, tj).  pre: (bblk, ti, H, tj) -- H on sublanes, j on
        # lanes, so the H-contraction is VPU adds + one 8-sublane reduce.
        pre = a[:, :, :, None] + bm_ref[...][:, None, :, :]
        z = jnp.maximum(pre, 0.0)
        e = jnp.sum(z * w2_ref[...][None, None, :, :], axis=2) + b2_ref[0, 0]
    else:
        # Fallback (previously validated) layout: H on lanes, lane-axis reduce.
        pre = a[:, :, None, :] + bm_ref[...][:, None, :, :]
        z = jnp.maximum(pre, 0.0)
        e = jnp.sum(z * w2_ref[...][None, None, :, :], axis=-1) + b2_ref[0, 0]
    e = jnp.where(e > 0, e, 0.01 * e)                     # LeakyReLU(0.01)

    adj_blk = adj_ref[...]                                # (bblk, ti, tj)
    masked = jnp.where(adj_blk == 0.0, -1.0e9, e)

    m_prev = m_sc[...]                                    # (bblk, ti, 1)
    m_new = jnp.maximum(m_prev, jnp.max(masked, axis=-1, keepdims=True))
    alpha = jnp.exp(m_prev - m_new)
    p = jnp.exp(masked - m_new)                           # (bblk, ti, tj)
    l_sc[...] = alpha * l_sc[...] + jnp.sum(p, axis=-1, keepdims=True)
    # The reference multiplies softmax by latent_adj (needed e.g. for isolated rows),
    # so the numerator is gated by the adjacency.
    pg = (p * adj_blk).astype(hv_ref.dtype)
    acc_sc[...] = alpha * acc_sc[...] + jnp.einsum(
        "bit,btm->bim", pg, hv_ref[...], preferred_element_type=jnp.float32)
    m_sc[...] = m_new

    @pl.when(kj == nj - 1)
    def _finalize():
        # Exact divide (not approx reciprocal) so the f32 path matches the reference.
        out_ref[...] = jnp.maximum(acc_sc[...] / l_sc[...], 0.0).astype(out_ref.dtype)


# --------------------------------------------------------------------------- #
# layer wrapper
# --------------------------------------------------------------------------- #
def gat_layer(feature, adj, params, *, use_bf16=True, h_on_sublanes=True):
    B, N, D = feature.shape
    w, b, w1a, w1b, b1, w2, b2 = params
    M = w.shape[1]
    H = w1a.shape[1]
    cdt = jnp.bfloat16 if use_bf16 else jnp.float32
    ti_target, vmem_limit = _chip_config()

    # Pad N so the j axis is lane-dense (multiple of 128 for big graphs) and the
    # i axis packs cleanly into 8/16-row sublane groups.  Padded columns are
    # neutralized by the zero adjacency; padded rows are sliced off at the end.
    if N > 128:
        n_pad = _round_up(N, 128)
    else:
        n_pad = _round_up(N, 16 if use_bf16 else 8)
    if n_pad != N:
        feature = jnp.pad(feature, ((0, 0), (0, n_pad - N), (0, 0)))
        adj = jnp.pad(adj, ((0, 0), (0, n_pad - N), (0, n_pad - N)))

    # ---------------- phase 1: projections, once per layer ----------------
    rows = B * n_pad
    tr = _pick_rows_tile(rows)
    w_c, w1a_c, w1b_c = w.astype(cdt), w1a.astype(cdt), w1b.astype(cdt)
    h2, a2, bm2 = pl.pallas_call(
        _gat_proj_kernel,
        out_shape=(jax.ShapeDtypeStruct((rows, M), cdt),
                   jax.ShapeDtypeStruct((rows, H), jnp.float32),
                   jax.ShapeDtypeStruct((rows, H), jnp.float32)),
        grid_spec=pltpu.PrefetchScalarGridSpec(
            num_scalar_prefetch=0,
            grid=(rows // tr,),
            in_specs=[pl.BlockSpec((tr, D), lambda r: (r, 0)),
                      pl.BlockSpec((D, M), lambda r: (0, 0)),
                      pl.BlockSpec((1, M), lambda r: (0, 0)),
                      pl.BlockSpec((M, H), lambda r: (0, 0)),
                      pl.BlockSpec((M, H), lambda r: (0, 0)),
                      pl.BlockSpec((1, H), lambda r: (0, 0))],
            out_specs=[pl.BlockSpec((tr, M), lambda r: (r, 0)),
                       pl.BlockSpec((tr, H), lambda r: (r, 0)),
                       pl.BlockSpec((tr, H), lambda r: (r, 0))]),
        compiler_params=pltpu.CompilerParams(
            dimension_semantics=("parallel",),
            vmem_limit_bytes=vmem_limit),
    )(feature.reshape(rows, D), w_c, b, w1a_c, w1b_c, b1)
    hval = h2.reshape(B, n_pad, M)        # value matrix, already in MXU dtype
    a_mat = a2.reshape(B, n_pad, H)       # i-side logits (b1 folded in)
    bm_mat = bm2.reshape(B, n_pad, H)     # j-side logits

    # ---------------- phase 2: pairwise attention ----------------
    ti = _pick_tile(n_pad, ti_target, 16 if use_bf16 else 8)
    tj = _pick_tile(n_pad, 128, 128)
    ni, nj = n_pad // ti, n_pad // tj
    bblk = _pick_batch_block(B, n_pad, ni)
    nb = B // bblk

    if h_on_sublanes:
        # Bm pre-transposed (cheap, once per layer) so the pairwise block has H
        # on sublanes and j on lanes; w2 as a (H, 1) column.
        bm_in = jnp.transpose(bm_mat, (0, 2, 1))                  # (B, H, n_pad)
        bm_spec = pl.BlockSpec((bblk, H, tj), lambda bi, ii, kj: (bi, 0, kj))
        w2_in = jnp.transpose(w2)                                 # (H, 1)
        w2_spec = pl.BlockSpec((H, 1), lambda bi, ii, kj: (0, 0))
    else:
        bm_in = bm_mat                                            # (B, n_pad, H)
        bm_spec = pl.BlockSpec((bblk, tj, H), lambda bi, ii, kj: (bi, kj, 0))
        w2_in = w2                                                # (1, H)
        w2_spec = pl.BlockSpec((1, H), lambda bi, ii, kj: (0, 0))

    kernel = functools.partial(_gat_pairwise_kernel, h_on_sublanes=h_on_sublanes)
    out = pl.pallas_call(
        kernel,
        out_shape=jax.ShapeDtypeStruct((B, n_pad, M), jnp.float32),
        grid_spec=pltpu.PrefetchScalarGridSpec(
            num_scalar_prefetch=0,
            grid=(nb, ni, nj),
            in_specs=[
                pl.BlockSpec((bblk, ti, H), lambda bi, ii, kj: (bi, ii, 0)),   # A
                bm_spec,                                                        # Bm
                pl.BlockSpec((bblk, tj, M), lambda bi, ii, kj: (bi, kj, 0)),   # h (values)
                pl.BlockSpec((bblk, ti, tj), lambda bi, ii, kj: (bi, ii, kj)),  # adjacency
                w2_spec,                                                        # afcs fc2 weight
                pl.BlockSpec(memory_space=pltpu.MemorySpace.SMEM),              # afcs fc2 bias
            ],
            out_specs=pl.BlockSpec((bblk, ti, M), lambda bi, ii, kj: (bi, ii, 0)),
            scratch_shapes=[
                pltpu.VMEM((bblk, ti, 1), jnp.float32),   # running max
                pltpu.VMEM((bblk, ti, 1), jnp.float32),   # running sum
                pltpu.VMEM((bblk, ti, M), jnp.float32),   # output accumulator
            ]),
        compiler_params=pltpu.CompilerParams(
            dimension_semantics=("parallel", "parallel", "arbitrary"),
            vmem_limit_bytes=vmem_limit),
    )(a_mat, bm_in, hval, adj, w2_in, b2)
    return out[:, :N, :]


# --------------------------------------------------------------------------- #
# fast-layout probe (one-time): verify the sublane-H variant lowers + is correct
# on the running jax/Mosaic; otherwise fall back to the lane-reduce layout.
# --------------------------------------------------------------------------- #
_FAST_OK = [None]


def _fast_variant_supported():
    if _FAST_OK[0] is None:
        try:
            ks = jax.random.split(jax.random.PRNGKey(1), 8)
            Bt, Nt, Dt, Mt, Ht = 1, 16, 32, 128, 128
            f = jax.random.normal(ks[0], (Bt, Nt, Dt), jnp.float32)
            adj = (jax.random.uniform(ks[1], (Bt, Nt, Nt)) > 0.5).astype(jnp.float32)
            params = (
                jax.random.normal(ks[2], (Dt, Mt), jnp.float32) * 0.1,
                jnp.zeros((1, Mt), jnp.float32),
                jax.random.normal(ks[3], (Mt, Ht), jnp.float32) * 0.05,
                jax.random.normal(ks[4], (Mt, Ht), jnp.float32) * 0.05,
                jnp.zeros((1, Ht), jnp.float32),
                jax.random.normal(ks[5], (1, Ht), jnp.float32) * 0.05,
                jnp.zeros((1, 1), jnp.float32),
            )
            out = gat_layer(f, adj, params, use_bf16=False, h_on_sublanes=True)
            ref = gat_reference(f, adj, [params])
            _FAST_OK[0] = bool(jnp.allclose(out, ref, rtol=2e-3, atol=2e-3))
        except Exception:
            _FAST_OK[0] = False
    return _FAST_OK[0]


def gat_forward(feature, latent_adj, layer_params, *, use_bf16=True):
    fast = _fast_variant_supported()
    feat = feature
    for params in layer_params:
        try:
            feat = gat_layer(feat, latent_adj, params,
                             use_bf16=use_bf16, h_on_sublanes=fast)
        except Exception:
            feat = gat_layer(feat, latent_adj, params,
                             use_bf16=use_bf16, h_on_sublanes=False)
    return feat


# --------------------------------------------------------------------------- #
# pure-JAX reference reproducing the PyTorch forward semantics
# --------------------------------------------------------------------------- #
def gat_reference(feature, latent_adj, layer_params):
    ref = feature
    for (w, b, w1a, w1b, b1, w2, b2) in layer_params:
        h = ref @ w + b                                          # (B, N, M)
        A = h @ w1a                                              # (B, N, H)
        Bm = h @ w1b                                             # (B, N, H)
        pre = A[:, :, None, :] + Bm[:, None, :, :] + b1          # (B, N, N, H)
        e = jnp.sum(jnp.maximum(pre, 0.0) * w2[0], axis=-1) + b2[0, 0]
        e = jnp.where(e > 0, e, 0.01 * e)                        # LeakyReLU(0.01)
        masked = jnp.where(latent_adj == 0.0, -1.0e9, e)
        att = jax.nn.softmax(masked, axis=-1) * latent_adj
        ref = jnp.maximum(jnp.einsum("bij,bjd->bid", att, h), 0.0)
    return ref


# --------------------------------------------------------------------------- #
if __name__ == "__main__":
    key = jax.random.PRNGKey(0)
    B, N = 2, 8
    in_dim, mem_dim, hidden = 64, 128, 128
    num_layers = 2

    ks = jax.random.split(key, 12)
    feature = jax.random.normal(ks[0], (B, N, in_dim), dtype=jnp.float32)
    adj_raw = jax.random.uniform(ks[1], (B, N, N))
    latent_adj = (adj_raw > 0.4).astype(jnp.float32)             # 0/1 latent adjacency

    # shared attention MLP params (self.afcs), split into h_i / h_j halves
    w1a = jax.random.normal(ks[2], (mem_dim, hidden), dtype=jnp.float32) * 0.05
    w1b = jax.random.normal(ks[3], (mem_dim, hidden), dtype=jnp.float32) * 0.05
    b1 = jax.random.normal(ks[4], (1, hidden), dtype=jnp.float32) * 0.05
    w2 = jax.random.normal(ks[5], (1, hidden), dtype=jnp.float32) * 0.05
    b2 = jax.random.normal(ks[6], (1, 1), dtype=jnp.float32) * 0.05

    # per-layer node transforms: layer 0 (in_dim -> mem), layer 1 (mem -> mem)
    w_l0 = jax.random.normal(ks[7], (in_dim, mem_dim), dtype=jnp.float32) * 0.1
    b_l0 = jax.random.normal(ks[8], (1, mem_dim), dtype=jnp.float32) * 0.1
    w_l1 = jax.random.normal(ks[9], (mem_dim, mem_dim), dtype=jnp.float32) * 0.1
    b_l1 = jax.random.normal(ks[10], (1, mem_dim), dtype=jnp.float32) * 0.1

    layer_params = [
        (w_l0, b_l0, w1a, w1b, b1, w2, b2),
        (w_l1, b_l1, w1a, w1b, b1, w2, b2),
    ]

    ref = gat_reference(feature, latent_adj, layer_params)

    # f32 MXU path: tight check against the PyTorch-equivalent reference.
    out_f32 = jax.block_until_ready(
        gat_forward(feature, latent_adj, layer_params, use_bf16=False))
    assert out_f32.shape == (B, N, mem_dim)
    assert jnp.allclose(out_f32, ref, rtol=2e-3, atol=2e-3), \
        "f32 Pallas output mismatches reference"

    # bf16 MXU operands with f32 accumulation (fast path on v5e/v6e/v7x).
    out_bf16 = jax.block_until_ready(
        gat_forward(feature, latent_adj, layer_params, use_bf16=True))
    assert out_bf16.shape == (B, N, mem_dim)
    assert jnp.allclose(out_bf16, ref, rtol=5e-2, atol=5e-2), \
        "bf16 Pallas output mismatches reference"

    print("KERNEL_OK")
</pallas_src>

<mosaic_0001>
module attributes {stable_mosaic.version = 11 : i64} {
  func.func @_gat_proj_kernel(%arg0: i32, %arg1: memref<16x32xf32, #tpu.memory_space<vmem>>, %arg2: memref<32x128xf32, #tpu.memory_space<vmem>>, %arg3: memref<1x128xf32, #tpu.memory_space<vmem>>, %arg4: memref<128x128xf32, #tpu.memory_space<vmem>>, %arg5: memref<128x128xf32, #tpu.memory_space<vmem>>, %arg6: memref<1x128xf32, #tpu.memory_space<vmem>>, %arg7: memref<16x128xf32, #tpu.memory_space<vmem>>, %arg8: memref<16x128xf32, #tpu.memory_space<vmem>>, %arg9: memref<16x128xf32, #tpu.memory_space<vmem>>) attributes {dimension_semantics = [#tpu.dimension_semantics<parallel>], iteration_bounds = array<i64: 1>, scalar_prefetch = 0 : i64, scratch_operands = 0 : i64, tpu.core_type = #tpu.core_type<tc>, window_params = [{transform_indices = @transform_0, window_bounds = array<i64: 16, 32>}, {pipeline_mode = #tpu.pipeline_mode<synchronous>, transform_indices = @transform_1, window_bounds = array<i64: 32, 128>}, {pipeline_mode = #tpu.pipeline_mode<synchronous>, transform_indices = @transform_2, window_bounds = array<i64: 1, 128>}, {pipeline_mode = #tpu.pipeline_mode<synchronous>, transform_indices = @transform_3, window_bounds = array<i64: 128, 128>}, {pipeline_mode = #tpu.pipeline_mode<synchronous>, transform_indices = @transform_4, window_bounds = array<i64: 128, 128>}, {pipeline_mode = #tpu.pipeline_mode<synchronous>, transform_indices = @transform_5, window_bounds = array<i64: 1, 128>}, {transform_indices = @transform_6, window_bounds = array<i64: 16, 128>}, {transform_indices = @transform_7, window_bounds = array<i64: 16, 128>}, {transform_indices = @transform_8, window_bounds = array<i64: 16, 128>}]} {
    %c0 = arith.constant 0 : index
    %c0_0 = arith.constant 0 : index
    %0 = vector.load %arg1[%c0, %c0_0] : memref<16x32xf32, #tpu.memory_space<vmem>>, vector<16x32xf32>
    %c0_1 = arith.constant 0 : index
    %c0_2 = arith.constant 0 : index
    %1 = vector.load %arg2[%c0_1, %c0_2] : memref<32x128xf32, #tpu.memory_space<vmem>>, vector<32x128xf32>
    %cst = arith.constant dense<0.000000e+00> : vector<16x128xf32>
    %2 = tpu.matmul %0, %1, %cst {dimension_numbers = #tpu.dot_dimension_numbers<[1], [0], [0], [1], [0, 0, 1, 1], [], []>} : vector<16x32xf32>, vector<32x128xf32>, vector<16x128xf32> -> vector<16x128xf32>
    %c0_3 = arith.constant 0 : index
    %c0_4 = arith.constant 0 : index
    %3 = vector.load %arg3[%c0_3, %c0_4] : memref<1x128xf32, #tpu.memory_space<vmem>>, vector<1x128xf32>
    %4 = vector.broadcast %3 : vector<1x128xf32> to vector<16x128xf32>
    %5 = arith.addf %2, %4 : vector<16x128xf32>
    %c0_5 = arith.constant 0 : index
    %c0_6 = arith.constant 0 : index
    %6 = vector.load %arg7[%c0_5, %c0_6] : memref<16x128xf32, #tpu.memory_space<vmem>>, vector<16x128xf32>
    tpu.vector_store %arg7[%c0_5, %c0_6], %5 {strides = array<i32>} : memref<16x128xf32, #tpu.memory_space<vmem>>, vector<16x128xf32>,
    %c0_7 = arith.constant 0 : index
    %c0_8 = arith.constant 0 : index
    %7 = vector.load %arg4[%c0_7, %c0_8] : memref<128x128xf32, #tpu.memory_space<vmem>>, vector<128x128xf32>
    %cst_9 = arith.constant dense<0.000000e+00> : vector<16x128xf32>
    %8 = tpu.matmul %5, %7, %cst_9 {dimension_numbers = #tpu.dot_dimension_numbers<[1], [0], [0], [1], [0, 0, 1, 1], [], []>} : vector<16x128xf32>, vector<128x128xf32>, vector<16x128xf32> -> vector<16x128xf32>
    %c0_10 = arith.constant 0 : index
    %c0_11 = arith.constant 0 : index
    %9 = vector.load %arg6[%c0_10, %c0_11] : memref<1x128xf32, #tpu.memory_space<vmem>>, vector<1x128xf32>
    %10 = vector.broadcast %9 : vector<1x128xf32> to vector<16x128xf32>
    %11 = arith.addf %8, %10 : vector<16x128xf32>
    %c0_12 = arith.constant 0 : index
    %c0_13 = arith.constant 0 : index
    %12 = vector.load %arg8[%c0_12, %c0_13] : memref<16x128xf32, #tpu.memory_space<vmem>>, vector<16x128xf32>
    tpu.vector_store %arg8[%c0_12, %c0_13], %11 {strides = array<i32>} : memref<16x128xf32, #tpu.memory_space<vmem>>, vector<16x128xf32>,
    %c0_14 = arith.constant 0 : index
    %c0_15 = arith.constant 0 : index
    %13 = vector.load %arg5[%c0_14, %c0_15] : memref<128x128xf32, #tpu.memory_space<vmem>>, vector<128x128xf32>
    %cst_16 = arith.constant dense<0.000000e+00> : vector<16x128xf32>
    %14 = tpu.matmul %5, %13, %cst_16 {dimension_numbers = #tpu.dot_dimension_numbers<[1], [0], [0], [1], [0, 0, 1, 1], [], []>} : vector<16x128xf32>, vector<128x128xf32>, vector<16x128xf32> -> vector<16x128xf32>
    %c0_17 = arith.constant 0 : index
    %c0_18 = arith.constant 0 : index
    %15 = vector.load %arg9[%c0_17, %c0_18] : memref<16x128xf32, #tpu.memory_space<vmem>>, vector<16x128xf32>
    tpu.vector_store %arg9[%c0_17, %c0_18], %14 {strides = array<i32>} : memref<16x128xf32, #tpu.memory_space<vmem>>, vector<16x128xf32>,
    return
  }
  func.func @transform_0(%arg0: i32) -> (i32, i32) {
    %c0_i32 = arith.constant 0 : i32
    %c0_i32_0 = arith.constant 0 : i32
    return %arg0, %c0_i32 : i32, i32
  }
  func.func @transform_1(%arg0: i32) -> (i32, i32) {
    %c0_i32 = arith.constant 0 : i32
    %c0_i32_0 = arith.constant 0 : i32
    %c0_i32_1 = arith.constant 0 : i32
    return %c0_i32, %c0_i32_0 : i32, i32
  }
  func.func @transform_2(%arg0: i32) -> (i32, i32) {
    %c0_i32 = arith.constant 0 : i32
    %c0_i32_0 = arith.constant 0 : i32
    %c0_i32_1 = arith.constant 0 : i32
    return %c0_i32, %c0_i32_0 : i32, i32
  }
  func.func @transform_3(%arg0: i32) -> (i32, i32) {
    %c0_i32 = arith.constant 0 : i32
    %c0_i32_0 = arith.constant 0 : i32
    %c0_i32_1 = arith.constant 0 : i32
    return %c0_i32, %c0_i32_0 : i32, i32
  }
  func.func @transform_4(%arg0: i32) -> (i32, i32) {
    %c0_i32 = arith.constant 0 : i32
    %c0_i32_0 = arith.constant 0 : i32
    %c0_i32_1 = arith.constant 0 : i32
    return %c0_i32, %c0_i32_0 : i32, i32
  }
  func.func @transform_5(%arg0: i32) -> (i32, i32) {
    %c0_i32 = arith.constant 0 : i32
    %c0_i32_0 = arith.constant 0 : i32
    %c0_i32_1 = arith.constant 0 : i32
    return %c0_i32, %c0_i32_0 : i32, i32
  }
  func.func @transform_6(%arg0: i32) -> (i32, i32) {
    %c0_i32 = arith.constant 0 : i32
    %c0_i32_0 = arith.constant 0 : i32
    return %arg0, %c0_i32 : i32, i32
  }
  func.func @transform_7(%arg0: i32) -> (i32, i32) {
    %c0_i32 = arith.constant 0 : i32
    %c0_i32_0 = arith.constant 0 : i32
    return %arg0, %c0_i32 : i32, i32
  }
  func.func @transform_8(%arg0: i32) -> (i32, i32) {
    %c0_i32 = arith.constant 0 : i32
    %c0_i32_0 = arith.constant 0 : i32
    return %arg0, %c0_i32 : i32, i32
  }
}

module attributes {stable_mosaic.version = 11 : i64} {
  func.func @_gat_proj_kernel(%arg0: i32, %arg1: memref<16x64xf32, #tpu.memory_space<vmem>>, %arg2: memref<64x128xf32, #tpu.memory_space<vmem>>, %arg3: memref<1x128xf32, #tpu.memory_space<vmem>>, %arg4: memref<128x128xf32, #tpu.memory_space<vmem>>, %arg5: memref<128x128xf32, #tpu.memory_space<vmem>>, %arg6: memref<1x128xf32, #tpu.memory_space<vmem>>, %arg7: memref<16x128xf32, #tpu.memory_space<vmem>>, %arg8: memref<16x128xf32, #tpu.memory_space<vmem>>, %arg9: memref<16x128xf32, #tpu.memory_space<vmem>>) attributes {dimension_semantics = [#tpu.dimension_semantics<parallel>], iteration_bounds = array<i64: 1>, scalar_prefetch = 0 : i64, scratch_operands = 0 : i64, tpu.core_type = #tpu.core_type<tc>, window_params = [{transform_indices = @transform_0, window_bounds = array<i64: 16, 64>}, {pipeline_mode = #tpu.pipeline_mode<synchronous>, transform_indices = @transform_1, window_bounds = array<i64: 64, 128>}, {pipeline_mode = #tpu.pipeline_mode<synchronous>, transform_indices = @transform_2, window_bounds = array<i64: 1, 128>}, {pipeline_mode = #tpu.pipeline_mode<synchronous>, transform_indices = @transform_3, window_bounds = array<i64: 128, 128>}, {pipeline_mode = #tpu.pipeline_mode<synchronous>, transform_indices = @transform_4, window_bounds = array<i64: 128, 128>}, {pipeline_mode = #tpu.pipeline_mode<synchronous>, transform_indices = @transform_5, window_bounds = array<i64: 1, 128>}, {transform_indices = @transform_6, window_bounds = array<i64: 16, 128>}, {transform_indices = @transform_7, window_bounds = array<i64: 16, 128>}, {transform_indices = @transform_8, window_bounds = array<i64: 16, 128>}]} {
    %c0 = arith.constant 0 : index
    %c0_0 = arith.constant 0 : index
    %0 = vector.load %arg1[%c0, %c0_0] : memref<16x64xf32, #tpu.memory_space<vmem>>, vector<16x64xf32>
    %c0_1 = arith.constant 0 : index
    %c0_2 = arith.constant 0 : index
    %1 = vector.load %arg2[%c0_1, %c0_2] : memref<64x128xf32, #tpu.memory_space<vmem>>, vector<64x128xf32>
    %cst = arith.constant dense<0.000000e+00> : vector<16x128xf32>
    %2 = tpu.matmul %0, %1, %cst {dimension_numbers = #tpu.dot_dimension_numbers<[1], [0], [0], [1], [0, 0, 1, 1], [], []>} : vector<16x64xf32>, vector<64x128xf32>, vector<16x128xf32> -> vector<16x128xf32>
    %c0_3 = arith.constant 0 : index
    %c0_4 = arith.constant 0 : index
    %3 = vector.load %arg3[%c0_3, %c0_4] : memref<1x128xf32, #tpu.memory_space<vmem>>, vector<1x128xf32>
    %4 = vector.broadcast %3 : vector<1x128xf32> to vector<16x128xf32>
    %5 = arith.addf %2, %4 : vector<16x128xf32>
    %c0_5 = arith.constant 0 : index
    %c0_6 = arith.constant 0 : index
    %6 = vector.load %arg7[%c0_5, %c0_6] : memref<16x128xf32, #tpu.memory_space<vmem>>, vector<16x128xf32>
    tpu.vector_store %arg7[%c0_5, %c0_6], %5 {strides = array<i32>} : memref<16x128xf32, #tpu.memory_space<vmem>>, vector<16x128xf32>,
    %c0_7 = arith.constant 0 : index
    %c0_8 = arith.constant 0 : index
    %7 = vector.load %arg4[%c0_7, %c0_8] : memref<128x128xf32, #tpu.memory_space<vmem>>, vector<128x128xf32>
    %cst_9 = arith.constant dense<0.000000e+00> : vector<16x128xf32>
    %8 = tpu.matmul %5, %7, %cst_9 {dimension_numbers = #tpu.dot_dimension_numbers<[1], [0], [0], [1], [0, 0, 1, 1], [], []>} : vector<16x128xf32>, vector<128x128xf32>, vector<16x128xf32> -> vector<16x128xf32>
    %c0_10 = arith.constant 0 : index
    %c0_11 = arith.constant 0 : index
    %9 = vector.load %arg6[%c0_10, %c0_11] : memref<1x128xf32, #tpu.memory_space<vmem>>, vector<1x128xf32>
    %10 = vector.broadcast %9 : vector<1x128xf32> to vector<16x128xf32>
    %11 = arith.addf %8, %10 : vector<16x128xf32>
    %c0_12 = arith.constant 0 : index
    %c0_13 = arith.constant 0 : index
    %12 = vector.load %arg8[%c0_12, %c0_13] : memref<16x128xf32, #tpu.memory_space<vmem>>, vector<16x128xf32>
    tpu.vector_store %arg8[%c0_12, %c0_13], %11 {strides = array<i32>} : memref<16x128xf32, #tpu.memory_space<vmem>>, vector<16x128xf32>,
    %c0_14 = arith.constant 0 : index
    %c0_15 = arith.constant 0 : index
    %13 = vector.load %arg5[%c0_14, %c0_15] : memref<128x128xf32, #tpu.memory_space<vmem>>, vector<128x128xf32>
    %cst_16 = arith.constant dense<0.000000e+00> : vector<16x128xf32>
    %14 = tpu.matmul %5, %13, %cst_16 {dimension_numbers = #tpu.dot_dimension_numbers<[1], [0], [0], [1], [0, 0, 1, 1], [], []>} : vector<16x128xf32>, vector<128x128xf32>, vector<16x128xf32> -> vector<16x128xf32>
    %c0_17 = arith.constant 0 : index
    %c0_18 = arith.constant 0 : index
    %15 = vector.load %arg9[%c0_17, %c0_18] : memref<16x128xf32, #tpu.memory_space<vmem>>, vector<16x128xf32>
    tpu.vector_store %arg9[%c0_17, %c0_18], %14 {strides = array<i32>} : memref<16x128xf32, #tpu.memory_space<vmem>>, vector<16x128xf32>,
    return
  }
  func.func @transform_0(%arg0: i32) -> (i32, i32) {
    %c0_i32 = arith.constant 0 : i32
    %c0_i32_0 = arith.constant 0 : i32
    return %arg0, %c0_i32 : i32, i32
  }
  func.func @transform_1(%arg0: i32) -> (i32, i32) {
    %c0_i32 = arith.constant 0 : i32
    %c0_i32_0 = arith.constant 0 : i32
    %c0_i32_1 = arith.constant 0 : i32
    return %c0_i32, %c0_i32_0 : i32, i32
  }
  func.func @transform_2(%arg0: i32) -> (i32, i32) {
    %c0_i32 = arith.constant 0 : i32
    %c0_i32_0 = arith.constant 0 : i32
    %c0_i32_1 = arith.constant 0 : i32
    return %c0_i32, %c0_i32_0 : i32, i32
  }
  func.func @transform_3(%arg0: i32) -> (i32, i32) {
    %c0_i32 = arith.constant 0 : i32
    %c0_i32_0 = arith.constant 0 : i32
    %c0_i32_1 = arith.constant 0 : i32
    return %c0_i32, %c0_i32_0 : i32, i32
  }
  func.func @transform_4(%arg0: i32) -> (i32, i32) {
    %c0_i32 = arith.constant 0 : i32
    %c0_i32_0 = arith.constant 0 : i32
    %c0_i32_1 = arith.constant 0 : i32
    return %c0_i32, %c0_i32_0 : i32, i32
  }
  func.func @transform_5(%arg0: i32) -> (i32, i32) {
    %c0_i32 = arith.constant 0 : i32
    %c0_i32_0 = arith.constant 0 : i32
    %c0_i32_1 = arith.constant 0 : i32
    return %c0_i32, %c0_i32_0 : i32, i32
  }
  func.func @transform_6(%arg0: i32) -> (i32, i32) {
    %c0_i32 = arith.constant 0 : i32
    %c0_i32_0 = arith.constant 0 : i32
    return %arg0, %c0_i32 : i32, i32
  }
  func.func @transform_7(%arg0: i32) -> (i32, i32) {
    %c0_i32 = arith.constant 0 : i32
    %c0_i32_0 = arith.constant 0 : i32
    return %arg0, %c0_i32 : i32, i32
  }
  func.func @transform_8(%arg0: i32) -> (i32, i32) {
    %c0_i32 = arith.constant 0 : i32
    %c0_i32_0 = arith.constant 0 : i32
    return %arg0, %c0_i32 : i32, i32
  }
}

module attributes {stable_mosaic.version = 11 : i64} {
  func.func @_gat_proj_kernel(%arg0: i32, %arg1: memref<16x64xf32, #tpu.memory_space<vmem>>, %arg2: memref<64x128xf32, #tpu.memory_space<vmem>>, %arg3: memref<1x128xf32, #tpu.memory_space<vmem>>, %arg4: memref<128x128xf32, #tpu.memory_space<vmem>>, %arg5: memref<128x128xf32, #tpu.memory_space<vmem>>, %arg6: memref<1x128xf32, #tpu.memory_space<vmem>>, %arg7: memref<16x128xf32, #tpu.memory_space<vmem>>, %arg8: memref<16x128xf32, #tpu.memory_space<vmem>>, %arg9: memref<16x128xf32, #tpu.memory_space<vmem>>) attributes {dimension_semantics = [#tpu.dimension_semantics<parallel>], iteration_bounds = array<i64: 1>, scalar_prefetch = 0 : i64, scratch_operands = 0 : i64, tpu.core_type = #tpu.core_type<tc>, window_params = [{transform_indices = @transform_0, window_bounds = array<i64: 16, 64>}, {pipeline_mode = #tpu.pipeline_mode<synchronous>, transform_indices = @transform_1, window_bounds = array<i64: 64, 128>}, {pipeline_mode = #tpu.pipeline_mode<synchronous>, transform_indices = @transform_2, window_bounds = array<i64: 1, 128>}, {pipeline_mode = #tpu.pipeline_mode<synchronous>, transform_indices = @transform_3, window_bounds = array<i64: 128, 128>}, {pipeline_mode = #tpu.pipeline_mode<synchronous>, transform_indices = @transform_4, window_bounds = array<i64: 128, 128>}, {pipeline_mode = #tpu.pipeline_mode<synchronous>, transform_indices = @transform_5, window_bounds = array<i64: 1, 128>}, {transform_indices = @transform_6, window_bounds = array<i64: 16, 128>}, {transform_indices = @transform_7, window_bounds = array<i64: 16, 128>}, {transform_indices = @transform_8, window_bounds = array<i64: 16, 128>}]} {
    %c0 = arith.constant 0 : index
    %c0_0 = arith.constant 0 : index
    %0 = vector.load %arg1[%c0, %c0_0] : memref<16x64xf32, #tpu.memory_space<vmem>>, vector<16x64xf32>
    %c0_1 = arith.constant 0 : index
    %c0_2 = arith.constant 0 : index
    %1 = vector.load %arg2[%c0_1, %c0_2] : memref<64x128xf32, #tpu.memory_space<vmem>>, vector<64x128xf32>
    %cst = arith.constant dense<0.000000e+00> : vector<16x128xf32>
    %2 = tpu.matmul %0, %1, %cst {dimension_numbers = #tpu.dot_dimension_numbers<[1], [0], [0], [1], [0, 0, 1, 1], [], []>} : vector<16x64xf32>, vector<64x128xf32>, vector<16x128xf32> -> vector<16x128xf32>
    %c0_3 = arith.constant 0 : index
    %c0_4 = arith.constant 0 : index
    %3 = vector.load %arg3[%c0_3, %c0_4] : memref<1x128xf32, #tpu.memory_space<vmem>>, vector<1x128xf32>
    %4 = vector.broadcast %3 : vector<1x128xf32> to vector<16x128xf32>
    %5 = arith.addf %2, %4 : vector<16x128xf32>
    %c0_5 = arith.constant 0 : index
    %c0_6 = arith.constant 0 : index
    %6 = vector.load %arg7[%c0_5, %c0_6] : memref<16x128xf32, #tpu.memory_space<vmem>>, vector<16x128xf32>
    tpu.vector_store %arg7[%c0_5, %c0_6], %5 {strides = array<i32>} : memref<16x128xf32, #tpu.memory_space<vmem>>, vector<16x128xf32>,
    %c0_7 = arith.constant 0 : index
    %c0_8 = arith.constant 0 : index
    %7 = vector.load %arg4[%c0_7, %c0_8] : memref<128x128xf32, #tpu.memory_space<vmem>>, vector<128x128xf32>
    %cst_9 = arith.constant dense<0.000000e+00> : vector<16x128xf32>
    %8 = tpu.matmul %5, %7, %cst_9 {dimension_numbers = #tpu.dot_dimension_numbers<[1], [0], [0], [1], [0, 0, 1, 1], [], []>} : vector<16x128xf32>, vector<128x128xf32>, vector<16x128xf32> -> vector<16x128xf32>
    %c0_10 = arith.constant 0 : index
    %c0_11 = arith.constant 0 : index
    %9 = vector.load %arg6[%c0_10, %c0_11] : memref<1x128xf32, #tpu.memory_space<vmem>>, vector<1x128xf32>
    %10 = vector.broadcast %9 : vector<1x128xf32> to vector<16x128xf32>
    %11 = arith.addf %8, %10 : vector<16x128xf32>
    %c0_12 = arith.constant 0 : index
    %c0_13 = arith.constant 0 : index
    %12 = vector.load %arg8[%c0_12, %c0_13] : memref<16x128xf32, #tpu.memory_space<vmem>>, vector<16x128xf32>
    tpu.vector_store %arg8[%c0_12, %c0_13], %11 {strides = array<i32>} : memref<16x128xf32, #tpu.memory_space<vmem>>, vector<16x128xf32>,
    %c0_14 = arith.constant 0 : index
    %c0_15 = arith.constant 0 : index
    %13 = vector.load %arg5[%c0_14, %c0_15] : memref<128x128xf32, #tpu.memory_space<vmem>>, vector<128x128xf32>
    %cst_16 = arith.constant dense<0.000000e+00> : vector<16x128xf32>
    %14 = tpu.matmul %5, %13, %cst_16 {dimension_numbers = #tpu.dot_dimension_numbers<[1], [0], [0], [1], [0, 0, 1, 1], [], []>} : vector<16x128xf32>, vector<128x128xf32>, vector<16x128xf32> -> vector<16x128xf32>
    %c0_17 = arith.constant 0 : index
    %c0_18 = arith.constant 0 : index
    %15 = vector.load %arg9[%c0_17, %c0_18] : memref<16x128xf32, #tpu.memory_space<vmem>>, vector<16x128xf32>
    tpu.vector_store %arg9[%c0_17, %c0_18], %14 {strides = array<i32>} : memref<16x128xf32, #tpu.memory_space<vmem>>, vector<16x128xf32>,
    return
  }
  func.func @transform_0(%arg0: i32) -> (i32, i32) {
    %c0_i32 = arith.constant 0 : i32
    %c0_i32_0 = arith.constant 0 : i32
    return %arg0, %c0_i32 : i32, i32
  }
  func.func @transform_1(%arg0: i32) -> (i32, i32) {
    %c0_i32 = arith.constant 0 : i32
    %c0_i32_0 = arith.constant 0 : i32
    %c0_i32_1 = arith.constant 0 : i32
    return %c0_i32, %c0_i32_0 : i32, i32
  }
  func.func @transform_2(%arg0: i32) -> (i32, i32) {
    %c0_i32 = arith.constant 0 : i32
    %c0_i32_0 = arith.constant 0 : i32
    %c0_i32_1 = arith.constant 0 : i32
    return %c0_i32, %c0_i32_0 : i32, i32
  }
  func.func @transform_3(%arg0: i32) -> (i32, i32) {
    %c0_i32 = arith.constant 0 : i32
    %c0_i32_0 = arith.constant 0 : i32
    %c0_i32_1 = arith.constant 0 : i32
    return %c0_i32, %c0_i32_0 : i32, i32
  }
  func.func @transform_4(%arg0: i32) -> (i32, i32) {
    %c0_i32 = arith.constant 0 : i32
    %c0_i32_0 = arith.constant 0 : i32
    %c0_i32_1 = arith.constant 0 : i32
    return %c0_i32, %c0_i32_0 : i32, i32
  }
  func.func @transform_5(%arg0: i32) -> (i32, i32) {
    %c0_i32 = arith.constant 0 : i32
    %c0_i32_0 = arith.constant 0 : i32
    %c0_i32_1 = arith.constant 0 : i32
    return %c0_i32, %c0_i32_0 : i32, i32
  }
  func.func @transform_6(%arg0: i32) -> (i32, i32) {
    %c0_i32 = arith.constant 0 : i32
    %c0_i32_0 = arith.constant 0 : i32
    return %arg0, %c0_i32 : i32, i32
  }
  func.func @transform_7(%arg0: i32) -> (i32, i32) {
    %c0_i32 = arith.constant 0 : i32
    %c0_i32_0 = arith.constant 0 : i32
    return %arg0, %c0_i32 : i32, i32
  }
  func.func @transform_8(%arg0: i32) -> (i32, i32) {
    %c0_i32 = arith.constant 0 : i32
    %c0_i32_0 = arith.constant 0 : i32
    return %arg0, %c0_i32 : i32, i32
  }
}

</mosaic_0001>

<bundles_post_ra>
// kernel: tpu_custom_call.1
= control target key start
LH: loop header
LB: loop body
LE: loop exit
PB: predicated region body
PF: predicated region fallthrough
CT: control target
= control target key end

     0   :  { %14 = vsyncpa [#allocation3], 0  ;;  %s983_s0 = inlined_call_operand.hbm [shape: f32[16,32], index: 0, kind: input, shape index: {}]   ;;  %s984_s1 = inlined_call_operand.hbm [shape: f32[32,128], index: 1, kind: input, shape index: {}]   ;;  %s985_s2 = inlined_call_operand.vmem [shape: f32[1,128], index: 2, kind: input, shape index: {}]   ;;  %s986_s3 = inlined_call_operand.hbm [shape: f32[128,128], index: 3, kind: input, shape index: {}]   ;;  %s987_s4 = inlined_call_operand.hbm [shape: f32[128,128], index: 4, kind: input, shape index: {}]   ;;  %s988_s5 = inlined_call_operand.vmem [shape: f32[1,128], index: 5, kind: input, shape index: {}]   ;;  %s989_s6 = inlined_call_operand.hbm [shape: f32[16,128], index: 6, kind: output, shape index: {0}]   ;;  %s990_s7 = inlined_call_operand.hbm [shape: f32[16,128], index: 7, kind: output, shape index: {1}]   ;;  %s991_s8 = inlined_call_operand.hbm [shape: f32[16,128], index: 8, kind: output, shape index: {2}]  }
   0x1   :  { %15 = vsyncpa [#allocation6], 0 }
   0x2   :  { %16 = vsyncpa [#allocation9], 0 }
   0x3   :  { %17 = vsyncpa [#allocation4], 0 }
   0x4   :  { %18 = vsyncpa [#allocation12], 0  ;;  %s795_s27 = smov [#allocation5]   ;;  %s796_s29 = smov [#allocation2]  }
   0x5   :  { %s36_s28 = sshll.u32 %s795_s27, 4  ;;  %s24_s30 = sshll.u32 %s796_s29, 4  ;;  %s37_s28 = int_to_ptr.vmem [resolvable:$true] %s36_s28  ;;  %s849_s30 = int_to_ptr.vmem [resolvable:$true] %s24_s30 }
   0x6   :  { %s631_s11 = scalar_lea.hbm %s984_s1, 512 }
   0x7   :  { %p632_p0 = scmp.ne.s32.totalorder %s984_s1, %s631_s11  ;;  %p635_p1 = scmp.lt.u32.totalorder %s631_s11, %s984_s1 }
   0x9   :  { %p637_p2 = pnand %p635_p1, %p632_p0 }
   0xb   :  { %640 = shalt.err (!%p637_p2)
}
   0xc   :  { %s641_s16 = scalar_lea.vmem %s37_s28, 512  ;;  %p646_p4 = scmp.lt.s32.totalorder %s37_s28, %s37_s28 }
   0xd   :  { %p642_p3 = scmp.ne.s32.totalorder %s37_s28, %s641_s16  ;;  %p647_p5 = scmp.lt.s32.totalorder %s641_s16, %s641_s16 }
   0xf   :  { %p648_p6 = por %p647_p5, %p646_p4 }
  0x11   :  { %p649_p7 = pnand %p648_p6, %p642_p3 }
  0x13   :  { %652 = shalt.err (!%p649_p7)
}
  0x14   :  { %s797_s17 = smov 128   ;;  %s798_s18 = smov 8  }
  0x15   :  { %42 = dma.hbm_to_vmem [thread:$0]  %s984_s1, 512, %s37_s28, [#allocation6], %s797_s17, %s797_s17, %s798_s18  }
  0x16   :  { %s653_s23 = scalar_lea.hbm %s983_s0, 256 }
  0x17   :  { %p654_p8 = scmp.ne.s32.totalorder %s983_s0, %s653_s23  ;;  %p657_p9 = scmp.lt.u32.totalorder %s653_s23, %s983_s0 }
  0x19   :  { %p659_p10 = pnand %p657_p9, %p654_p8 }
  0x1b   :  { %662 = shalt.err (!%p659_p10)
}
  0x1c   :  { %s663_s29 = scalar_lea.vmem %s849_s30, 256  ;;  %p668_p12 = scmp.lt.s32.totalorder %s849_s30, %s849_s30 }
  0x1d   :  { %p664_p11 = scmp.ne.s32.totalorder %s849_s30, %s663_s29  ;;  %p669_p13 = scmp.lt.s32.totalorder %s663_s29, %s663_s29 }
  0x1f   :  { %p670_p0 = por %p669_p13, %p668_p12 }
  0x21   :  { %p671_p1 = pnand %p670_p0, %p664_p11 }
  0x23   :  { %674 = shalt.err (!%p671_p1)
}
  0x24   :  { %30 = dma.hbm_to_vmem [thread:$0]  %s983_s0, 256, %s849_s30, [#allocation3], %s797_s17, %s797_s17, %s798_s18  }
  0x25   :  { %s799_s9 = smov [#allocation7]   ;;  %s800_s11 = smov [#allocation8]  }
  0x26   :  { %s50_s10 = sshll.u32 %s799_s9, 4  ;;  %s62_s12 = sshll.u32 %s800_s11, 4  ;;  %s51_s10 = int_to_ptr.vmem [resolvable:$true] %s50_s10  ;;  %s886_s12 = int_to_ptr.vmem [resolvable:$true] %s62_s12 }
  0x27   :  { %s675_s15 = scalar_lea.hbm %s986_s3, 2048 }
  0x28   :  { %p676_p2 = scmp.ne.s32.totalorder %s986_s3, %s675_s15  ;;  %p679_p3 = scmp.lt.u32.totalorder %s675_s15, %s986_s3 }
  0x2a   :  { %p681_p4 = pnand %p679_p3, %p676_p2 }
  0x2c   :  { %684 = shalt.err (!%p681_p4)
}
  0x2d   :  { %s685_s0 = scalar_lea.vmem %s51_s10, 2048  ;;  %p690_p6 = scmp.lt.s32.totalorder %s51_s10, %s51_s10 }
  0x2e   :  { %p686_p5 = scmp.ne.s32.totalorder %s51_s10, %s685_s0  ;;  %p691_p7 = scmp.lt.s32.totalorder %s685_s0, %s685_s0 }
  0x30   :  { %p692_p8 = por %p691_p7, %p690_p6 }
  0x32   :  { %p693_p9 = pnand %p692_p8, %p686_p5 }
  0x34   :  { %696 = shalt.err (!%p693_p9)
}
  0x35   :  { %56 = dma.hbm_to_vmem [thread:$0]  %s986_s3, 2048, %s51_s10, [#allocation6], %s797_s17, %s797_s17, %s798_s18  }
  0x36   :  { %s697_s25 = scalar_lea.hbm %s987_s4, 2048 }
  0x37   :  { %p698_p10 = scmp.ne.s32.totalorder %s987_s4, %s697_s25  ;;  %p701_p11 = scmp.lt.u32.totalorder %s697_s25, %s987_s4 }
  0x39   :  { %p703_p12 = pnand %p701_p11, %p698_p10 }
  0x3b   :  { %706 = shalt.err (!%p703_p12)
}
  0x3c   :  { %s707_s28 = scalar_lea.vmem %s886_s12, 2048  ;;  %p712_p0 = scmp.lt.s32.totalorder %s886_s12, %s886_s12 }
  0x3d   :  { %p708_p13 = scmp.ne.s32.totalorder %s886_s12, %s707_s28  ;;  %p713_p1 = scmp.lt.s32.totalorder %s707_s28, %s707_s28 }
  0x3f   :  { %p714_p2 = por %p713_p1, %p712_p0 }
  0x41   :  { %p715_p3 = pnand %p714_p2, %p708_p13 }
  0x43   :  { %718 = shalt.err (!%p715_p3)
}
  0x44   :  { %68 = dma.hbm_to_vmem [thread:$0]  %s987_s4, 2048, %s886_s12, [#allocation9], %s797_s17, %s797_s17, %s798_s18  }
  0x45   :  { %785 = dma.done.wait [#allocation3], 256  }
  0x46   :  { %786 = vsyncadd [#allocation3], 4294967040 }
  0x47   :  { %787 = dma.done.wait [#allocation6], 2560  }
  0x48   :  { %788 = vsyncadd [#allocation6], 4294964736 }
  0x49   :  { %789 = dma.done.wait [#allocation9], 2048  }
  0x4a   :  { %790 = vsyncadd [#allocation9], 4294965248  ;;  %vm96_vm0 = vcmask 261120   ;;  %v85_v0 = vld [vmem:[#allocation5] sm:$0xff]  ;;  %v86_v1 = vld [vmem:[#allocation5 + $0x8] sm:$0xff]  ;;  %s801_s11 = smov [#allocation10]  }
  0x4b   :  { %v87_v2 = vld [vmem:[#allocation5 + $0x10] sm:$0xff]  ;;  %v550_v3 = vpack.c.bf16 %v86_v1, %v85_v0  ;;  %v88_v4 = vld [vmem:[#allocation5 + $0x18] sm:$0xff]  ;;  %v180_v7 = vld [vmem:[#allocation7] sm:$0xff]  ;;  %s378_s12 = sshll.u32 %s801_s11, 4  ;;  %s379_s12 = int_to_ptr.vmem [resolvable:$true] %s378_s12 }
  0x4c   :  { %v83_v5 = vld [vmem:[#allocation2] sm:$0xff]  ;;  %v554_v6 = vpack.c.bf16 %v88_v4, %v87_v2  ;;  %v181_v8 = vld [vmem:[#allocation7 + $0x8] sm:$0xff]  ;;  %v280_v9 = vld [vmem:[#allocation8] sm:$0xff]  ;;  %s719_s13 = scalar_lea.vmem %s379_s12, 256  ;;  %p724_p5 = scmp.lt.s32.totalorder %s379_s12, %s379_s12 }
  0x4d   :  { %477 = vmatprep.mubr.msk.f32.mxu0 %vm96_vm0, %v83_v5  ;;  %551 = vmatprep.subr.bf16.mxu0 %v550_v3  ;;  %v558_v10 = vpack.c.bf16 %v181_v8, %v180_v7  ;;  %v281_v11 = vld [vmem:[#allocation8 + $0x8] sm:$0xff]  ;;  %v182_v12 = vld [vmem:[#allocation7 + $0x10] sm:$0xff]  ;;  %v183_v13 = vld [vmem:[#allocation7 + $0x18] sm:$0xff]  ;;  %p720_p4 = scmp.ne.s32.totalorder %s379_s12, %s719_s13  ;;  %p725_p6 = scmp.lt.s32.totalorder %s719_s13, %s719_s13 }
  0x4e   :  { %553 = vmatpush3.bf16.msra.mxu0 %v550_v3  ;;  %v562_v14 = vpack.c.bf16 %v183_v13, %v182_v12  ;;  %v184_v15 = vld [vmem:[#allocation7 + $0x20] sm:$0xff]  ;;  %v590_v16 = vpack.c.bf16 %v281_v11, %v280_v9  ;;  %v185_v17 = vld [vmem:[#allocation7 + $0x28] sm:$0xff]  ;;  %v282_v18 = vld [vmem:[#allocation8 + $0x10] sm:$0xff] }
  0x4f   :  { %555 = vmatprep.subr.bf16.mxu0 %v554_v6  ;;  %559 = vmatprep.subr.bf16.mxu1 %v558_v10  ;;  %v283_v19 = vld [vmem:[#allocation8 + $0x18] sm:$0xff]  ;;  %v566_v20 = vpack.c.bf16 %v185_v17, %v184_v15  ;;  %v186_v22 = vld [vmem:[#allocation7 + $0x30] sm:$0xff]  ;;  %v284_v25 = vld [vmem:[#allocation8 + $0x20] sm:$0xff]  ;;  %p726_p7 = por %p725_p6, %p724_p5 }
  0x50   :  { %561 = vmatpush3.bf16.msra.mxu1 %v558_v10  ;;  %v84_v21 = vld [vmem:[#allocation2 + $0x8] sm:$0xff]  ;;  %v594_v24 = vpack.c.bf16 %v283_v19, %v282_v18  ;;  %v285_v26 = vld [vmem:[#allocation8 + $0x28] sm:$0xff]  ;;  %v188_v28 = vld [vmem:[#allocation7 + $0x40] sm:$0xff] }
  0x51   :  { %563 = vmatprep.subr.bf16.mxu1 %v562_v14  ;;  %v187_v23 = vld [vmem:[#allocation7 + $0x38] sm:$0xff]  ;;  %v189_v29 = vld [vmem:[#allocation7 + $0x48] sm:$0xff]  ;;  %v598_v30 = vpack.c.bf16 %v285_v26, %v284_v25  ;;  %v286_v31 = vld [vmem:[#allocation8 + $0x30] sm:$0xff]  ;;  %p727_p8 = pnand %p726_p7, %p720_p4 }
  0x52   :  { %557 = vmatpush3.bf16.msra.mxu0 %v554_v6  ;;  %v570_v27 = vpack.c.bf16 %v187_v23, %v186_v22  ;;  %v287_v32 = vld [vmem:[#allocation8 + $0x38] sm:$0xff]  ;;  %v574_v33 = vpack.c.bf16 %v189_v29, %v188_v28  ;;  %v190_v34 = vld [vmem:[#allocation7 + $0x50] sm:$0xff]  ;;  %v288_v37 = vld [vmem:[#allocation8 + $0x40] sm:$0xff] }
  0x53   :  { %591 = vmatprep.subr.bf16.mxu0 %v590_v16  ;;  %v191_v35 = vld [vmem:[#allocation7 + $0x58] sm:$0xff]  ;;  %v602_v36 = vpack.c.bf16 %v287_v32, %v286_v31  ;;  %v289_v38 = vld [vmem:[#allocation8 + $0x48] sm:$0xff]  ;;  %v192_v40 = vld [vmem:[#allocation7 + $0x60] sm:$0xff] }
  0x54   :  { %565 = vmatpush3.bf16.msra.mxu1 %v562_v14  ;;  %v578_v39 = vpack.c.bf16 %v191_v35, %v190_v34  ;;  %v193_v41 = vld [vmem:[#allocation7 + $0x68] sm:$0xff]  ;;  %v606_v42 = vpack.c.bf16 %v289_v38, %v288_v37  ;;  %v290_v43 = vld [vmem:[#allocation8 + $0x50] sm:$0xff]  ;;  %v291_v44 = vld [vmem:[#allocation8 + $0x58] sm:$0xff] }
  0x55   :  { %478 = vmatmul.mubr.msk.f32.vlgmr.msra.gmra.mrb[0].mxu0 %vm96_vm0, %v84_v21  ;;  %567 = vmatprep.subr.bf16.mxu1 %v566_v20  ;;  %v582_v45 = vpack.c.bf16 %v193_v41, %v192_v40  ;;  %v610_v46 = vpack.c.bf16 %v291_v44, %v290_v43  ;;  %v292_v47 = vld [vmem:[#allocation8 + $0x60] sm:$0xff]  ;;  %v293_v48 = vld [vmem:[#allocation8 + $0x68] sm:$0xff]  ;;  %v194_v50 = vld [vmem:[#allocation7 + $0x70] sm:$0xff] }
  0x56   :  { %593 = vmatpush3.bf16.msra.mxu0 %v590_v16  ;;  %v614_v49 = vpack.c.bf16 %v293_v48, %v292_v47  ;;  %v195_v51 = vld [vmem:[#allocation7 + $0x78] sm:$0xff]  ;;  %v294_v52 = vld [vmem:[#allocation8 + $0x70] sm:$0xff] }
  0x57   :  { %595 = vmatprep.subr.bf16.mxu0 %v594_v24  ;;  %v586_v53 = vpack.c.bf16 %v195_v51, %v194_v50  ;;  %v295_v54 = vld [vmem:[#allocation8 + $0x78] sm:$0xff]  ;;  %v423_v56 = vld [vmem:[%s985_s2] ss:$0 sm:$0xff] }
  0x58   :  { %569 = vmatpush3.bf16.msra.mxu1 %v566_v20  ;;  %v618_v55 = vpack.c.bf16 %v295_v54, %v294_v52 }
  0x59   :  { %571 = vmatprep.subr.bf16.mxu1 %v570_v27 }
  0x5a   :  { %597 = vmatpush3.bf16.msra.mxu0 %v594_v24 }
  0x5b   :  { %599 = vmatprep.subr.bf16.mxu0 %v598_v30 }
  0x5c   :  { %573 = vmatpush3.bf16.msra.mxu1 %v570_v27 }
  0x5d   :  { %575 = vmatprep.subr.bf16.mxu1 %v574_v33 }
  0x5e   :  { %601 = vmatpush3.bf16.msra.mxu0 %v598_v30 }
  0x5f   :  { %603 = vmatprep.subr.bf16.mxu0 %v602_v36 }
  0x60   :  { %577 = vmatpush3.bf16.msra.mxu1 %v574_v33 }
  0x61   :  { %579 = vmatprep.subr.bf16.mxu1 %v578_v39 }
  0x62   :  { %605 = vmatpush3.bf16.msra.mxu0 %v602_v36 }
  0x63   :  { %607 = vmatprep.subr.bf16.mxu0 %v606_v42 }
  0x64   :  { %581 = vmatpush3.bf16.msra.mxu1 %v578_v39 }
  0x65   :  { %583 = vmatprep.subr.bf16.mxu1 %v582_v45 }
  0x66   :  { %609 = vmatpush3.bf16.msra.mxu0 %v606_v42 }
  0x67   :  { %611 = vmatprep.subr.bf16.mxu0 %v610_v46 }
  0x68   :  { %585 = vmatpush3.bf16.msra.mxu1 %v582_v45 }
  0x69   :  { %587 = vmatprep.subr.bf16.mxu1 %v586_v53 }
  0x6a   :  { %613 = vmatpush3.bf16.msra.mxu0 %v610_v46 }
  0x6b   :  { %615 = vmatprep.subr.bf16.mxu0 %v614_v49 }
  0x6c   :  { %589 = vmatpush3.bf16.msra.mxu1 %v586_v53 }
  0x6e   :  { %617 = vmatpush3.bf16.msra.mxu0 %v614_v49 }
  0x6f   :  { %619 = vmatprep.subr.bf16.mxu0 %v618_v55 }
  0x72   :  { %621 = vmatpush3.bf16.msra.mxu0 %v618_v55 }
 0x128   :  { %v479_v57 = vpop.f32.mrb[0].mxu0 }
 0x129   :  { %v175_v58 = vadd.f32 %v479_v57, %v423_v56  ;;  %v169_v59 = vpop.f32.mrb[1].mxu0 }
 0x12a   :  { %v170_v60 = vadd.f32 %v423_v56, %v169_v59 }
 0x12b   :  { %179 = vst [vmem:[#allocation10 + $0x8] sm:$0xff] %v175_v58 }
 0x12c   :  { %178 = vst [vmem:[#allocation10] sm:$0xff] %v170_v60  ;;  %512 = vmatprep.mubr.f32.mxu1 %v170_v60  ;;  %547 = vmatprep.mubr.f32.mxu0 %v170_v60 }
 0x12d   :  { %513 = vmatmul.mubr.f32.vlgmr.msra.gmra.mrb[0].mxu1 %v175_v58  ;;  %548 = vmatmul.mubr.f32.vlgmr.msra.gmra.mrb[2].mxu0 %v175_v58 }
 0x12e   :  { %730 = shalt.err (!%p727_p8)
}
 0x12f   :  { %s731_s15 = scalar_lea.hbm %s989_s6, 256 }
 0x130   :  { %p732_p9 = scmp.ne.s32.totalorder %s989_s6, %s731_s15  ;;  %p735_p10 = scmp.lt.u32.totalorder %s731_s15, %s989_s6 }
 0x132   :  { %p737_p11 = pnand %p735_p10, %p732_p9 }
 0x134   :  { %740 = shalt.err (!%p737_p11)
}
 0x135   :  { %384 = dma.vmem_to_hbm [thread:$0]  %s379_s12, 256, %s989_s6, [#allocation4], %s797_s17, %s797_s17, %s798_s18  }
 0x136   :  { %v426_v61 = vld [vmem:[%s988_s5] ss:$0 sm:$0xff]  ;;  %s802_s24 = smov [#allocation11]   ;;  %s803_s26 = smov [#allocation13]  }
 0x137   :  { %s390_s25 = sshll.u32 %s802_s24, 4  ;;  %s402_s27 = sshll.u32 %s803_s26, 4  ;;  %s391_s25 = int_to_ptr.vmem [resolvable:$true] %s390_s25  ;;  %s946_s27 = int_to_ptr.vmem [resolvable:$true] %s402_s27 }
 0x138   :  { %s741_s6 = scalar_lea.vmem %s391_s25, 256  ;;  %p746_p13 = scmp.lt.s32.totalorder %s391_s25, %s391_s25 }
 0x139   :  { %p742_p12 = scmp.ne.s32.totalorder %s391_s25, %s741_s6  ;;  %p747_p0 = scmp.lt.s32.totalorder %s741_s6, %s741_s6 }
 0x13b   :  { %p748_p1 = por %p747_p0, %p746_p13 }
 0x13d   :  { %p749_p2 = pnand %p748_p1, %p742_p12 }
 0x200   :  { %v514_v62 = vpop.f32.mrb[0].mxu1  ;;  %v549_v63 = vpop.f32.mrb[2].mxu0 }
 0x201   :  { %v275_v0 = vadd.f32 %v514_v62, %v426_v61  ;;  %372 = vst [vmem:[#allocation13 + $0x8] sm:$0xff] %v549_v63  ;;  %v269_v1 = vpop.f32.mrb[1].mxu1  ;;  %v362_v2 = vpop.f32.mrb[3].mxu0 }
 0x202   :  { %v270_v3 = vadd.f32 %v426_v61, %v269_v1  ;;  %371 = vst [vmem:[#allocation13] sm:$0xff] %v362_v2 }
 0x203   :  { %279 = vst [vmem:[#allocation11 + $0x8] sm:$0xff] %v275_v0 }
 0x204   :  { %278 = vst [vmem:[#allocation11] sm:$0xff] %v270_v3 }
 0x205   :  { %752 = shalt.err (!%p749_p2)
}
 0x206   :  { %s753_s1 = scalar_lea.hbm %s990_s7, 256 }
 0x207   :  { %p754_p3 = scmp.ne.s32.totalorder %s990_s7, %s753_s1  ;;  %p757_p4 = scmp.lt.u32.totalorder %s753_s1, %s990_s7 }
 0x209   :  { %p759_p5 = pnand %p757_p4, %p754_p3 }
 0x20b   :  { %762 = shalt.err (!%p759_p5)
}
 0x20c   :  { %396 = dma.vmem_to_hbm [thread:$0]  %s391_s25, 256, %s990_s7, [#allocation12], %s797_s17, %s797_s17, %s798_s18  }
 0x20d   :  { %s763_s12 = scalar_lea.vmem %s946_s27, 256  ;;  %p768_p7 = scmp.lt.s32.totalorder %s946_s27, %s946_s27 }
 0x20e   :  { %p764_p6 = scmp.ne.s32.totalorder %s946_s27, %s763_s12  ;;  %p769_p8 = scmp.lt.s32.totalorder %s763_s12, %s763_s12 }
 0x210   :  { %p770_p9 = por %p769_p8, %p768_p7 }
 0x212   :  { %p771_p10 = pnand %p770_p9, %p764_p6 }
 0x214   :  { %774 = shalt.err (!%p771_p10)
}
 0x215   :  { %s775_s14 = scalar_lea.hbm %s991_s8, 256 }
 0x216   :  { %p776_p11 = scmp.ne.s32.totalorder %s991_s8, %s775_s14  ;;  %p779_p12 = scmp.lt.u32.totalorder %s775_s14, %s991_s8 }
 0x218   :  { %p781_p13 = pnand %p779_p12, %p776_p11 }
 0x21a   :  { %784 = shalt.err (!%p781_p13)
}
 0x21b   :  { %408 = dma.vmem_to_hbm [thread:$0]  %s946_s27, 256, %s991_s8, [#allocation12], %s797_s17, %s797_s17, %s798_s18  }
 0x21c   :  { %791 = dma.done.wait [#allocation4], 256  }
 0x21d   :  { %792 = vsyncadd [#allocation4], 4294967040 }
 0x21e   :  { %793 = dma.done.wait [#allocation12], 512  }
 0x21f   :  { %794 = vsyncadd [#allocation12], 4294966784 }
 0x220   :  { %418 = vsyncpa [#allocation3], 1 }
 0x221   :  { %419 = vsyncpa [#allocation6], 1 }
 0x222   :  { %420 = vsyncpa [#allocation9], 1 }
 0x223   :  { %421 = vsyncpa [#allocation4], 1 }
 0x224   :  { %422 = vsyncpa [#allocation12], 1 }

// kernel: tpu_custom_call.1
= control target key start
LH: loop header
LB: loop body
LE: loop exit
PB: predicated region body
PF: predicated region fallthrough
CT: control target
= control target key end

     0   :  { %14 = vsyncpa [#allocation3], 0  ;;  %s1007_s0 = inlined_call_operand.hbm [shape: f32[16,64], index: 0, kind: input, shape index: {}]   ;;  %s1008_s1 = inlined_call_operand.hbm [shape: f32[64,128], index: 1, kind: input, shape index: {}]   ;;  %s1009_s2 = inlined_call_operand.vmem [shape: f32[1,128], index: 2, kind: input, shape index: {}]   ;;  %s1010_s3 = inlined_call_operand.hbm [shape: f32[128,128], index: 3, kind: input, shape index: {}]   ;;  %s1011_s4 = inlined_call_operand.hbm [shape: f32[128,128], index: 4, kind: input, shape index: {}]   ;;  %s1012_s5 = inlined_call_operand.vmem [shape: f32[1,128], index: 5, kind: input, shape index: {}]   ;;  %s1013_s6 = inlined_call_operand.hbm [shape: f32[16,128], index: 6, kind: output, shape index: {0}]   ;;  %s1014_s7 = inlined_call_operand.hbm [shape: f32[16,128], index: 7, kind: output, shape index: {1}]   ;;  %s1015_s8 = inlined_call_operand.hbm [shape: f32[16,128], index: 8, kind: output, shape index: {2}]  }
   0x1   :  { %15 = vsyncpa [#allocation6], 0 }
   0x2   :  { %16 = vsyncpa [#allocation9], 0 }
   0x3   :  { %17 = vsyncpa [#allocation4], 0 }
   0x4   :  { %18 = vsyncpa [#allocation12], 0  ;;  %s819_s27 = smov [#allocation5]   ;;  %s820_s29 = smov [#allocation2]  }
   0x5   :  { %s36_s28 = sshll.u32 %s819_s27, 4  ;;  %s24_s30 = sshll.u32 %s820_s29, 4  ;;  %s37_s28 = int_to_ptr.vmem [resolvable:$true] %s36_s28  ;;  %s873_s30 = int_to_ptr.vmem [resolvable:$true] %s24_s30 }
   0x6   :  { %s655_s11 = scalar_lea.hbm %s1008_s1, 1024 }
   0x7   :  { %p656_p0 = scmp.ne.s32.totalorder %s1008_s1, %s655_s11  ;;  %p659_p1 = scmp.lt.u32.totalorder %s655_s11, %s1008_s1 }
   0x9   :  { %p661_p2 = pnand %p659_p1, %p656_p0 }
   0xb   :  { %664 = shalt.err (!%p661_p2)
}
   0xc   :  { %s665_s16 = scalar_lea.vmem %s37_s28, 1024  ;;  %p670_p4 = scmp.lt.s32.totalorder %s37_s28, %s37_s28 }
   0xd   :  { %p666_p3 = scmp.ne.s32.totalorder %s37_s28, %s665_s16  ;;  %p671_p5 = scmp.lt.s32.totalorder %s665_s16, %s665_s16 }
   0xf   :  { %p672_p6 = por %p671_p5, %p670_p4 }
  0x11   :  { %p673_p7 = pnand %p672_p6, %p666_p3 }
  0x13   :  { %676 = shalt.err (!%p673_p7)
}
  0x14   :  { %s821_s17 = smov 128   ;;  %s822_s18 = smov 8  }
  0x15   :  { %42 = dma.hbm_to_vmem [thread:$0]  %s1008_s1, 1024, %s37_s28, [#allocation6], %s821_s17, %s821_s17, %s822_s18  }
  0x16   :  { %s677_s23 = scalar_lea.hbm %s1007_s0, 256 }
  0x17   :  { %p678_p8 = scmp.ne.s32.totalorder %s1007_s0, %s677_s23  ;;  %p681_p9 = scmp.lt.u32.totalorder %s677_s23, %s1007_s0 }
  0x19   :  { %p683_p10 = pnand %p681_p9, %p678_p8 }
  0x1b   :  { %686 = shalt.err (!%p683_p10)
}
  0x1c   :  { %s687_s29 = scalar_lea.vmem %s873_s30, 256  ;;  %p692_p12 = scmp.lt.s32.totalorder %s873_s30, %s873_s30 }
  0x1d   :  { %p688_p11 = scmp.ne.s32.totalorder %s873_s30, %s687_s29  ;;  %p693_p13 = scmp.lt.s32.totalorder %s687_s29, %s687_s29 }
  0x1f   :  { %p694_p0 = por %p693_p13, %p692_p12 }
  0x21   :  { %p695_p1 = pnand %p694_p0, %p688_p11 }
  0x23   :  { %698 = shalt.err (!%p695_p1)
}
  0x24   :  { %30 = dma.hbm_to_vmem [thread:$0]  %s1007_s0, 256, %s873_s30, [#allocation3], %s821_s17, %s821_s17, %s822_s18  }
  0x25   :  { %s823_s9 = smov [#allocation7]   ;;  %s824_s11 = smov [#allocation8]  }
  0x26   :  { %s50_s10 = sshll.u32 %s823_s9, 4  ;;  %s62_s12 = sshll.u32 %s824_s11, 4  ;;  %s51_s10 = int_to_ptr.vmem [resolvable:$true] %s50_s10  ;;  %s910_s12 = int_to_ptr.vmem [resolvable:$true] %s62_s12 }
  0x27   :  { %s699_s15 = scalar_lea.hbm %s1010_s3, 2048 }
  0x28   :  { %p700_p2 = scmp.ne.s32.totalorder %s1010_s3, %s699_s15  ;;  %p703_p3 = scmp.lt.u32.totalorder %s699_s15, %s1010_s3 }
  0x2a   :  { %p705_p4 = pnand %p703_p3, %p700_p2 }
  0x2c   :  { %708 = shalt.err (!%p705_p4)
}
  0x2d   :  { %s709_s0 = scalar_lea.vmem %s51_s10, 2048  ;;  %p714_p6 = scmp.lt.s32.totalorder %s51_s10, %s51_s10 }
  0x2e   :  { %p710_p5 = scmp.ne.s32.totalorder %s51_s10, %s709_s0  ;;  %p715_p7 = scmp.lt.s32.totalorder %s709_s0, %s709_s0 }
  0x30   :  { %p716_p8 = por %p715_p7, %p714_p6 }
  0x32   :  { %p717_p9 = pnand %p716_p8, %p710_p5 }
  0x34   :  { %720 = shalt.err (!%p717_p9)
}
  0x35   :  { %56 = dma.hbm_to_vmem [thread:$0]  %s1010_s3, 2048, %s51_s10, [#allocation6], %s821_s17, %s821_s17, %s822_s18  }
  0x36   :  { %s721_s25 = scalar_lea.hbm %s1011_s4, 2048 }
  0x37   :  { %p722_p10 = scmp.ne.s32.totalorder %s1011_s4, %s721_s25  ;;  %p725_p11 = scmp.lt.u32.totalorder %s721_s25, %s1011_s4 }
  0x39   :  { %p727_p12 = pnand %p725_p11, %p722_p10 }
  0x3b   :  { %730 = shalt.err (!%p727_p12)
}
  0x3c   :  { %s731_s28 = scalar_lea.vmem %s910_s12, 2048  ;;  %p736_p0 = scmp.lt.s32.totalorder %s910_s12, %s910_s12 }
  0x3d   :  { %p732_p13 = scmp.ne.s32.totalorder %s910_s12, %s731_s28  ;;  %p737_p1 = scmp.lt.s32.totalorder %s731_s28, %s731_s28 }
  0x3f   :  { %p738_p2 = por %p737_p1, %p736_p0 }
  0x41   :  { %p739_p3 = pnand %p738_p2, %p732_p13 }
  0x43   :  { %742 = shalt.err (!%p739_p3)
}
  0x44   :  { %68 = dma.hbm_to_vmem [thread:$0]  %s1011_s4, 2048, %s910_s12, [#allocation9], %s821_s17, %s821_s17, %s822_s18  }
  0x45   :  { %809 = dma.done.wait [#allocation3], 256  }
  0x46   :  { %810 = vsyncadd [#allocation3], 4294967040 }
  0x47   :  { %811 = dma.done.wait [#allocation6], 3072  }
  0x48   :  { %812 = vsyncadd [#allocation6], 4294964224 }
  0x49   :  { %813 = dma.done.wait [#allocation9], 2048  }
  0x4a   :  { %814 = vsyncadd [#allocation9], 4294965248  ;;  %v85_v0 = vld [vmem:[#allocation5] sm:$0xff]  ;;  %v86_v1 = vld [vmem:[#allocation5 + $0x8] sm:$0xff]  ;;  %vm100_vm0 = vcmask 523264   ;;  %s825_s11 = smov [#allocation10]  }
  0x4b   :  { %v87_v2 = vld [vmem:[#allocation5 + $0x10] sm:$0xff]  ;;  %v566_v3 = vpack.c.bf16 %v86_v1, %v85_v0  ;;  %v88_v4 = vld [vmem:[#allocation5 + $0x18] sm:$0xff]  ;;  %v89_v6 = vld [vmem:[#allocation5 + $0x20] sm:$0xff]  ;;  %s382_s12 = sshll.u32 %s825_s11, 4  ;;  %s383_s12 = int_to_ptr.vmem [resolvable:$true] %s382_s12 }
  0x4c   :  { %v570_v5 = vpack.c.bf16 %v88_v4, %v87_v2  ;;  %v90_v7 = vld [vmem:[#allocation5 + $0x28] sm:$0xff]  ;;  %v83_v8 = vld [vmem:[#allocation2] sm:$0xff]  ;;  %v184_v9 = vld [vmem:[#allocation7] sm:$0xff]  ;;  %s743_s13 = scalar_lea.vmem %s383_s12, 256  ;;  %p748_p5 = scmp.lt.s32.totalorder %s383_s12, %s383_s12 }
  0x4d   :  { %567 = vmatprep.subr.bf16.mxu0 %v566_v3  ;;  %493 = vmatprep.mubr.msk.f32.mxu0 %vm100_vm0, %v83_v8  ;;  %v185_v10 = vld [vmem:[#allocation7 + $0x8] sm:$0xff]  ;;  %v186_v12 = vld [vmem:[#allocation7 + $0x10] sm:$0xff]  ;;  %v574_v13 = vpack.c.bf16 %v90_v7, %v89_v6  ;;  %v187_v15 = vld [vmem:[#allocation7 + $0x18] sm:$0xff]  ;;  %p744_p4 = scmp.ne.s32.totalorder %s383_s12, %s743_s13  ;;  %p749_p6 = scmp.lt.s32.totalorder %s743_s13, %s743_s13 }
  0x4e   :  { %569 = vmatpush3.bf16.msra.mxu0 %v566_v3  ;;  %v582_v11 = vpack.c.bf16 %v185_v10, %v184_v9  ;;  %v91_v14 = vld [vmem:[#allocation5 + $0x30] sm:$0xff]  ;;  %v92_v16 = vld [vmem:[#allocation5 + $0x38] sm:$0xff]  ;;  %v586_v17 = vpack.c.bf16 %v187_v15, %v186_v12  ;;  %v188_v18 = vld [vmem:[#allocation7 + $0x20] sm:$0xff] }
  0x4f   :  { %571 = vmatprep.subr.bf16.mxu0 %v570_v5  ;;  %v189_v19 = vld [vmem:[#allocation7 + $0x28] sm:$0xff]  ;;  %v578_v21 = vpack.c.bf16 %v92_v16, %v91_v14  ;;  %v190_v22 = vld [vmem:[#allocation7 + $0x30] sm:$0xff]  ;;  %v191_v23 = vld [vmem:[#allocation7 + $0x38] sm:$0xff]  ;;  %p750_p7 = por %p749_p6, %p748_p5 }
  0x50   :  { %583 = vmatprep.subr.bf16.mxu1 %v582_v11  ;;  %v590_v20 = vpack.c.bf16 %v189_v19, %v188_v18  ;;  %v284_v24 = vld [vmem:[#allocation8] sm:$0xff]  ;;  %v285_v25 = vld [vmem:[#allocation8 + $0x8] sm:$0xff]  ;;  %v594_v26 = vpack.c.bf16 %v191_v23, %v190_v22  ;;  %v286_v30 = vld [vmem:[#allocation8 + $0x10] sm:$0xff] }
  0x51   :  { %585 = vmatpush3.bf16.msra.mxu1 %v582_v11  ;;  %v614_v27 = vpack.c.bf16 %v285_v25, %v284_v24  ;;  %v192_v28 = vld [vmem:[#allocation7 + $0x40] sm:$0xff]  ;;  %v193_v29 = vld [vmem:[#allocation7 + $0x48] sm:$0xff]  ;;  %v287_v31 = vld [vmem:[#allocation8 + $0x18] sm:$0xff]  ;;  %p751_p8 = pnand %p750_p7, %p744_p4 }
  0x52   :  { %573 = vmatpush3.bf16.msra.mxu0 %v570_v5  ;;  %587 = vmatprep.subr.bf16.mxu1 %v586_v17  ;;  %v84_v32 = vld [vmem:[#allocation2 + $0x8] sm:$0xff]  ;;  %v598_v33 = vpack.c.bf16 %v193_v29, %v192_v28  ;;  %v618_v34 = vpack.c.bf16 %v287_v31, %v286_v30  ;;  %v194_v35 = vld [vmem:[#allocation7 + $0x50] sm:$0xff]  ;;  %v288_v37 = vld [vmem:[#allocation8 + $0x20] sm:$0xff] }
  0x53   :  { %575 = vmatprep.subr.bf16.mxu0 %v574_v13  ;;  %v195_v36 = vld [vmem:[#allocation7 + $0x58] sm:$0xff]  ;;  %v289_v38 = vld [vmem:[#allocation8 + $0x28] sm:$0xff]  ;;  %v196_v41 = vld [vmem:[#allocation7 + $0x60] sm:$0xff] }
  0x54   :  { %v602_v39 = vpack.c.bf16 %v195_v36, %v194_v35  ;;  %v622_v40 = vpack.c.bf16 %v289_v38, %v288_v37  ;;  %v197_v42 = vld [vmem:[#allocation7 + $0x68] sm:$0xff]  ;;  %v290_v43 = vld [vmem:[#allocation8 + $0x30] sm:$0xff]  ;;  %v291_v44 = vld [vmem:[#allocation8 + $0x38] sm:$0xff] }
  0x55   :  { %589 = vmatpush3.bf16.msra.mxu1 %v586_v17  ;;  %v606_v45 = vpack.c.bf16 %v197_v42, %v196_v41  ;;  %v626_v46 = vpack.c.bf16 %v291_v44, %v290_v43  ;;  %v292_v47 = vld [vmem:[#allocation8 + $0x40] sm:$0xff]  ;;  %v293_v48 = vld [vmem:[#allocation8 + $0x48] sm:$0xff]  ;;  %v294_v50 = vld [vmem:[#allocation8 + $0x50] sm:$0xff] }
  0x56   :  { %577 = vmatpush3.bf16.msra.mxu0 %v574_v13  ;;  %591 = vmatprep.subr.bf16.mxu1 %v590_v20  ;;  %v630_v49 = vpack.c.bf16 %v293_v48, %v292_v47  ;;  %v295_v51 = vld [vmem:[#allocation8 + $0x58] sm:$0xff]  ;;  %v296_v53 = vld [vmem:[#allocation8 + $0x60] sm:$0xff]  ;;  %v297_v54 = vld [vmem:[#allocation8 + $0x68] sm:$0xff] }
  0x57   :  { %579 = vmatprep.subr.bf16.mxu0 %v578_v21  ;;  %v634_v52 = vpack.c.bf16 %v295_v51, %v294_v50  ;;  %v638_v55 = vpack.c.bf16 %v297_v54, %v296_v53  ;;  %v198_v56 = vld [vmem:[#allocation7 + $0x70] sm:$0xff]  ;;  %v199_v57 = vld [vmem:[#allocation7 + $0x78] sm:$0xff] }
  0x58   :  { %v298_v58 = vld [vmem:[#allocation8 + $0x70] sm:$0xff]  ;;  %v610_v59 = vpack.c.bf16 %v199_v57, %v198_v56  ;;  %v299_v60 = vld [vmem:[#allocation8 + $0x78] sm:$0xff] }
  0x59   :  { %593 = vmatpush3.bf16.msra.mxu1 %v590_v20  ;;  %v642_v61 = vpack.c.bf16 %v299_v60, %v298_v58  ;;  %v427_v62 = vld [vmem:[%s1009_s2] ss:$0 sm:$0xff] }
  0x5a   :  { %581 = vmatpush3.bf16.msra.mxu0 %v578_v21  ;;  %595 = vmatprep.subr.bf16.mxu1 %v594_v26 }
  0x5b   :  { %615 = vmatprep.subr.bf16.mxu0 %v614_v27 }
  0x5d   :  { %494 = vmatmul.mubr.msk.f32.vlgmr.msra.gmra.mrb[0].mxu0 %vm100_vm0, %v84_v32  ;;  %597 = vmatpush3.bf16.msra.mxu1 %v594_v26 }
  0x5e   :  { %617 = vmatpush3.bf16.msra.mxu0 %v614_v27  ;;  %599 = vmatprep.subr.bf16.mxu1 %v598_v33 }
  0x5f   :  { %619 = vmatprep.subr.bf16.mxu0 %v618_v34 }
  0x61   :  { %601 = vmatpush3.bf16.msra.mxu1 %v598_v33 }
  0x62   :  { %621 = vmatpush3.bf16.msra.mxu0 %v618_v34  ;;  %603 = vmatprep.subr.bf16.mxu1 %v602_v39 }
  0x63   :  { %623 = vmatprep.subr.bf16.mxu0 %v622_v40 }
  0x65   :  { %605 = vmatpush3.bf16.msra.mxu1 %v602_v39 }
  0x66   :  { %625 = vmatpush3.bf16.msra.mxu0 %v622_v40  ;;  %607 = vmatprep.subr.bf16.mxu1 %v606_v45 }
  0x67   :  { %627 = vmatprep.subr.bf16.mxu0 %v626_v46 }
  0x69   :  { %609 = vmatpush3.bf16.msra.mxu1 %v606_v45 }
  0x6a   :  { %629 = vmatpush3.bf16.msra.mxu0 %v626_v46  ;;  %611 = vmatprep.subr.bf16.mxu1 %v610_v59 }
  0x6b   :  { %631 = vmatprep.subr.bf16.mxu0 %v630_v49 }
  0x6d   :  { %613 = vmatpush3.bf16.msra.mxu1 %v610_v59 }
  0x6e   :  { %633 = vmatpush3.bf16.msra.mxu0 %v630_v49 }
  0x6f   :  { %635 = vmatprep.subr.bf16.mxu0 %v634_v52 }
  0x72   :  { %637 = vmatpush3.bf16.msra.mxu0 %v634_v52 }
  0x73   :  { %639 = vmatprep.subr.bf16.mxu0 %v638_v55 }
  0x76   :  { %641 = vmatpush3.bf16.msra.mxu0 %v638_v55 }
  0x77   :  { %643 = vmatprep.subr.bf16.mxu0 %v642_v61 }
  0x7a   :  { %645 = vmatpush3.bf16.msra.mxu0 %v642_v61 }
 0x130   :  { %v495_v63 = vpop.f32.mrb[0].mxu0 }
 0x131   :  { %v179_v0 = vadd.f32 %v495_v63, %v427_v62  ;;  %v173_v1 = vpop.f32.mrb[1].mxu0 }
 0x132   :  { %v174_v2 = vadd.f32 %v427_v62, %v173_v1 }
 0x133   :  { %183 = vst [vmem:[#allocation10 + $0x8] sm:$0xff] %v179_v0 }
 0x134   :  { %182 = vst [vmem:[#allocation10] sm:$0xff] %v174_v2  ;;  %528 = vmatprep.mubr.f32.mxu1 %v174_v2  ;;  %563 = vmatprep.mubr.f32.mxu0 %v174_v2 }
 0x135   :  { %529 = vmatmul.mubr.f32.vlgmr.msra.gmra.mrb[0].mxu1 %v179_v0  ;;  %564 = vmatmul.mubr.f32.vlgmr.msra.gmra.mrb[2].mxu0 %v179_v0 }
 0x136   :  { %754 = shalt.err (!%p751_p8)
}
 0x137   :  { %s755_s15 = scalar_lea.hbm %s1013_s6, 256 }
 0x138   :  { %p756_p9 = scmp.ne.s32.totalorder %s1013_s6, %s755_s15  ;;  %p759_p10 = scmp.lt.u32.totalorder %s755_s15, %s1013_s6 }
 0x13a   :  { %p761_p11 = pnand %p759_p10, %p756_p9 }
 0x13c   :  { %764 = shalt.err (!%p761_p11)
}
 0x13d   :  { %388 = dma.vmem_to_hbm [thread:$0]  %s383_s12, 256, %s1013_s6, [#allocation4], %s821_s17, %s821_s17, %s822_s18  }
 0x13e   :  { %v430_v3 = vld [vmem:[%s1012_s5] ss:$0 sm:$0xff]  ;;  %s826_s24 = smov [#allocation11]   ;;  %s827_s26 = smov [#allocation13]  }
 0x13f   :  { %s394_s25 = sshll.u32 %s826_s24, 4  ;;  %s406_s27 = sshll.u32 %s827_s26, 4  ;;  %s395_s25 = int_to_ptr.vmem [resolvable:$true] %s394_s25  ;;  %s970_s27 = int_to_ptr.vmem [resolvable:$true] %s406_s27 }
 0x140   :  { %s765_s6 = scalar_lea.vmem %s395_s25, 256  ;;  %p770_p13 = scmp.lt.s32.totalorder %s395_s25, %s395_s25 }
 0x141   :  { %p766_p12 = scmp.ne.s32.totalorder %s395_s25, %s765_s6  ;;  %p771_p0 = scmp.lt.s32.totalorder %s765_s6, %s765_s6 }
 0x143   :  { %p772_p1 = por %p771_p0, %p770_p13 }
 0x145   :  { %p773_p2 = pnand %p772_p1, %p766_p12 }
 0x208   :  { %v530_v4 = vpop.f32.mrb[0].mxu1  ;;  %v565_v5 = vpop.f32.mrb[2].mxu0 }
 0x209   :  { %v279_v6 = vadd.f32 %v530_v4, %v430_v3  ;;  %376 = vst [vmem:[#allocation13 + $0x8] sm:$0xff] %v565_v5  ;;  %v273_v7 = vpop.f32.mrb[1].mxu1  ;;  %v366_v8 = vpop.f32.mrb[3].mxu0 }
 0x20a   :  { %v274_v9 = vadd.f32 %v430_v3, %v273_v7  ;;  %375 = vst [vmem:[#allocation13] sm:$0xff] %v366_v8 }
 0x20b   :  { %283 = vst [vmem:[#allocation11 + $0x8] sm:$0xff] %v279_v6 }
 0x20c   :  { %282 = vst [vmem:[#allocation11] sm:$0xff] %v274_v9 }
 0x20d   :  { %776 = shalt.err (!%p773_p2)
}
 0x20e   :  { %s777_s1 = scalar_lea.hbm %s1014_s7, 256 }
 0x20f   :  { %p778_p3 = scmp.ne.s32.totalorder %s1014_s7, %s777_s1  ;;  %p781_p4 = scmp.lt.u32.totalorder %s777_s1, %s1014_s7 }
 0x211   :  { %p783_p5 = pnand %p781_p4, %p778_p3 }
 0x213   :  { %786 = shalt.err (!%p783_p5)
}
 0x214   :  { %400 = dma.vmem_to_hbm [thread:$0]  %s395_s25, 256, %s1014_s7, [#allocation12], %s821_s17, %s821_s17, %s822_s18  }
 0x215   :  { %s787_s12 = scalar_lea.vmem %s970_s27, 256  ;;  %p792_p7 = scmp.lt.s32.totalorder %s970_s27, %s970_s27 }
 0x216   :  { %p788_p6 = scmp.ne.s32.totalorder %s970_s27, %s787_s12  ;;  %p793_p8 = scmp.lt.s32.totalorder %s787_s12, %s787_s12 }
 0x218   :  { %p794_p9 = por %p793_p8, %p792_p7 }
 0x21a   :  { %p795_p10 = pnand %p794_p9, %p788_p6 }
 0x21c   :  { %798 = shalt.err (!%p795_p10)
}
 0x21d   :  { %s799_s14 = scalar_lea.hbm %s1015_s8, 256 }
 0x21e   :  { %p800_p11 = scmp.ne.s32.totalorder %s1015_s8, %s799_s14  ;;  %p803_p12 = scmp.lt.u32.totalorder %s799_s14, %s1015_s8 }
 0x220   :  { %p805_p13 = pnand %p803_p12, %p800_p11 }
 0x222   :  { %808 = shalt.err (!%p805_p13)
}
 0x223   :  { %412 = dma.vmem_to_hbm [thread:$0]  %s970_s27, 256, %s1015_s8, [#allocation12], %s821_s17, %s821_s17, %s822_s18  }
 0x224   :  { %815 = dma.done.wait [#allocation4], 256  }
 0x225   :  { %816 = vsyncadd [#allocation4], 4294967040 }
 0x226   :  { %817 = dma.done.wait [#allocation12], 512  }
 0x227   :  { %818 = vsyncadd [#allocation12], 4294966784 }
 0x228   :  { %422 = vsyncpa [#allocation3], 1 }
 0x229   :  { %423 = vsyncpa [#allocation6], 1 }
 0x22a   :  { %424 = vsyncpa [#allocation9], 1 }
 0x22b   :  { %425 = vsyncpa [#allocation4], 1 }
 0x22c   :  { %426 = vsyncpa [#allocation12], 1 }

// kernel: tpu_custom_call.1
= control target key start
LH: loop header
LB: loop body
LE: loop exit
PB: predicated region body
PF: predicated region fallthrough
CT: control target
= control target key end

     0   :  { %14 = vsyncpa [#allocation3], 0  ;;  %s1007_s0 = inlined_call_operand.hbm [shape: f32[16,64], index: 0, kind: input, shape index: {}]   ;;  %s1008_s1 = inlined_call_operand.hbm [shape: f32[64,128], index: 1, kind: input, shape index: {}]   ;;  %s1009_s2 = inlined_call_operand.vmem [shape: f32[1,128], index: 2, kind: input, shape index: {}]   ;;  %s1010_s3 = inlined_call_operand.hbm [shape: f32[128,128], index: 3, kind: input, shape index: {}]   ;;  %s1011_s4 = inlined_call_operand.hbm [shape: f32[128,128], index: 4, kind: input, shape index: {}]   ;;  %s1012_s5 = inlined_call_operand.vmem [shape: f32[1,128], index: 5, kind: input, shape index: {}]   ;;  %s1013_s6 = inlined_call_operand.hbm [shape: f32[16,128], index: 6, kind: output, shape index: {0}]   ;;  %s1014_s7 = inlined_call_operand.hbm [shape: f32[16,128], index: 7, kind: output, shape index: {1}]   ;;  %s1015_s8 = inlined_call_operand.hbm [shape: f32[16,128], index: 8, kind: output, shape index: {2}]  }
   0x1   :  { %15 = vsyncpa [#allocation6], 0 }
   0x2   :  { %16 = vsyncpa [#allocation9], 0 }
   0x3   :  { %17 = vsyncpa [#allocation4], 0 }
   0x4   :  { %18 = vsyncpa [#allocation12], 0  ;;  %s819_s27 = smov [#allocation5]   ;;  %s820_s29 = smov [#allocation2]  }
   0x5   :  { %s36_s28 = sshll.u32 %s819_s27, 4  ;;  %s24_s30 = sshll.u32 %s820_s29, 4  ;;  %s37_s28 = int_to_ptr.vmem [resolvable:$true] %s36_s28  ;;  %s873_s30 = int_to_ptr.vmem [resolvable:$true] %s24_s30 }
   0x6   :  { %s655_s11 = scalar_lea.hbm %s1008_s1, 1024 }
   0x7   :  { %p656_p0 = scmp.ne.s32.totalorder %s1008_s1, %s655_s11  ;;  %p659_p1 = scmp.lt.u32.totalorder %s655_s11, %s1008_s1 }
   0x9   :  { %p661_p2 = pnand %p659_p1, %p656_p0 }
   0xb   :  { %664 = shalt.err (!%p661_p2)
}
   0xc   :  { %s665_s16 = scalar_lea.vmem %s37_s28, 1024  ;;  %p670_p4 = scmp.lt.s32.totalorder %s37_s28, %s37_s28 }
   0xd   :  { %p666_p3 = scmp.ne.s32.totalorder %s37_s28, %s665_s16  ;;  %p671_p5 = scmp.lt.s32.totalorder %s665_s16, %s665_s16 }
   0xf   :  { %p672_p6 = por %p671_p5, %p670_p4 }
  0x11   :  { %p673_p7 = pnand %p672_p6, %p666_p3 }
  0x13   :  { %676 = shalt.err (!%p673_p7)
}
  0x14   :  { %s821_s17 = smov 128   ;;  %s822_s18 = smov 8  }
  0x15   :  { %42 = dma.hbm_to_vmem [thread:$0]  %s1008_s1, 1024, %s37_s28, [#allocation6], %s821_s17, %s821_s17, %s822_s18  }
  0x16   :  { %s677_s23 = scalar_lea.hbm %s1007_s0, 256 }
  0x17   :  { %p678_p8 = scmp.ne.s32.totalorder %s1007_s0, %s677_s23  ;;  %p681_p9 = scmp.lt.u32.totalorder %s677_s23, %s1007_s0 }
  0x19   :  { %p683_p10 = pnand %p681_p9, %p678_p8 }
  0x1b   :  { %686 = shalt.err (!%p683_p10)
}
  0x1c   :  { %s687_s29 = scalar_lea.vmem %s873_s30, 256  ;;  %p692_p12 = scmp.lt.s32.totalorder %s873_s30, %s873_s30 }
  0x1d   :  { %p688_p11 = scmp.ne.s32.totalorder %s873_s30, %s687_s29  ;;  %p693_p13 = scmp.lt.s32.totalorder %s687_s29, %s687_s29 }
  0x1f   :  { %p694_p0 = por %p693_p13, %p692_p12 }
  0x21   :  { %p695_p1 = pnand %p694_p0, %p688_p11 }
  0x23   :  { %698 = shalt.err (!%p695_p1)
}
  0x24   :  { %30 = dma.hbm_to_vmem [thread:$0]  %s1007_s0, 256, %s873_s30, [#allocation3], %s821_s17, %s821_s17, %s822_s18  }
  0x25   :  { %s823_s9 = smov [#allocation7]   ;;  %s824_s11 = smov [#allocation8]  }
  0x26   :  { %s50_s10 = sshll.u32 %s823_s9, 4  ;;  %s62_s12 = sshll.u32 %s824_s11, 4  ;;  %s51_s10 = int_to_ptr.vmem [resolvable:$true] %s50_s10  ;;  %s910_s12 = int_to_ptr.vmem [resolvable:$true] %s62_s12 }
  0x27   :  { %s699_s15 = scalar_lea.hbm %s1010_s3, 2048 }
  0x28   :  { %p700_p2 = scmp.ne.s32.totalorder %s1010_s3, %s699_s15  ;;  %p703_p3 = scmp.lt.u32.totalorder %s699_s15, %s1010_s3 }
  0x2a   :  { %p705_p4 = pnand %p703_p3, %p700_p2 }
  0x2c   :  { %708 = shalt.err (!%p705_p4)
}
  0x2d   :  { %s709_s0 = scalar_lea.vmem %s51_s10, 2048  ;;  %p714_p6 = scmp.lt.s32.totalorder %s51_s10, %s51_s10 }
  0x2e   :  { %p710_p5 = scmp.ne.s32.totalorder %s51_s10, %s709_s0  ;;  %p715_p7 = scmp.lt.s32.totalorder %s709_s0, %s709_s0 }
  0x30   :  { %p716_p8 = por %p715_p7, %p714_p6 }
  0x32   :  { %p717_p9 = pnand %p716_p8, %p710_p5 }
  0x34   :  { %720 = shalt.err (!%p717_p9)
}
  0x35   :  { %56 = dma.hbm_to_vmem [thread:$0]  %s1010_s3, 2048, %s51_s10, [#allocation6], %s821_s17, %s821_s17, %s822_s18  }
  0x36   :  { %s721_s25 = scalar_lea.hbm %s1011_s4, 2048 }
  0x37   :  { %p722_p10 = scmp.ne.s32.totalorder %s1011_s4, %s721_s25  ;;  %p725_p11 = scmp.lt.u32.totalorder %s721_s25, %s1011_s4 }
  0x39   :  { %p727_p12 = pnand %p725_p11, %p722_p10 }
  0x3b   :  { %730 = shalt.err (!%p727_p12)
}
  0x3c   :  { %s731_s28 = scalar_lea.vmem %s910_s12, 2048  ;;  %p736_p0 = scmp.lt.s32.totalorder %s910_s12, %s910_s12 }
  0x3d   :  { %p732_p13 = scmp.ne.s32.totalorder %s910_s12, %s731_s28  ;;  %p737_p1 = scmp.lt.s32.totalorder %s731_s28, %s731_s28 }
  0x3f   :  { %p738_p2 = por %p737_p1, %p736_p0 }
  0x41   :  { %p739_p3 = pnand %p738_p2, %p732_p13 }
  0x43   :  { %742 = shalt.err (!%p739_p3)
}
  0x44   :  { %68 = dma.hbm_to_vmem [thread:$0]  %s1011_s4, 2048, %s910_s12, [#allocation9], %s821_s17, %s821_s17, %s822_s18  }
  0x45   :  { %809 = dma.done.wait [#allocation3], 256  }
  0x46   :  { %810 = vsyncadd [#allocation3], 4294967040 }
  0x47   :  { %811 = dma.done.wait [#allocation6], 3072  }
  0x48   :  { %812 = vsyncadd [#allocation6], 4294964224 }
  0x49   :  { %813 = dma.done.wait [#allocation9], 2048  }
  0x4a   :  { %814 = vsyncadd [#allocation9], 4294965248  ;;  %v85_v0 = vld [vmem:[#allocation5] sm:$0xff]  ;;  %v86_v1 = vld [vmem:[#allocation5 + $0x8] sm:$0xff]  ;;  %vm100_vm0 = vcmask 523264   ;;  %s825_s11 = smov [#allocation10]  }
  0x4b   :  { %v87_v2 = vld [vmem:[#allocation5 + $0x10] sm:$0xff]  ;;  %v566_v3 = vpack.c.bf16 %v86_v1, %v85_v0  ;;  %v88_v4 = vld [vmem:[#allocation5 + $0x18] sm:$0xff]  ;;  %v89_v6 = vld [vmem:[#allocation5 + $0x20] sm:$0xff]  ;;  %s382_s12 = sshll.u32 %s825_s11, 4  ;;  %s383_s12 = int_to_ptr.vmem [resolvable:$true] %s382_s12 }
  0x4c   :  { %v570_v5 = vpack.c.bf16 %v88_v4, %v87_v2  ;;  %v90_v7 = vld [vmem:[#allocation5 + $0x28] sm:$0xff]  ;;  %v83_v8 = vld [vmem:[#allocation2] sm:$0xff]  ;;  %v184_v9 = vld [vmem:[#allocation7] sm:$0xff]  ;;  %s743_s13 = scalar_lea.vmem %s383_s12, 256  ;;  %p748_p5 = scmp.lt.s32.totalorder %s383_s12, %s383_s12 }
  0x4d   :  { %567 = vmatprep.subr.bf16.mxu0 %v566_v3  ;;  %493 = vmatprep.mubr.msk.f32.mxu0 %vm100_vm0, %v83_v8  ;;  %v185_v10 = vld [vmem:[#allocation7 + $0x8] sm:$0xff]  ;;  %v186_v12 = vld [vmem:[#allocation7 + $0x10] sm:$0xff]  ;;  %v574_v13 = vpack.c.bf16 %v90_v7, %v89_v6  ;;  %v187_v15 = vld [vmem:[#allocation7 + $0x18] sm:$0xff]  ;;  %p744_p4 = scmp.ne.s32.totalorder %s383_s12, %s743_s13  ;;  %p749_p6 = scmp.lt.s32.totalorder %s743_s13, %s743_s13 }
  0x4e   :  { %569 = vmatpush3.bf16.msra.mxu0 %v566_v3  ;;  %v582_v11 = vpack.c.bf16 %v185_v10, %v184_v9  ;;  %v91_v14 = vld [vmem:[#allocation5 + $0x30] sm:$0xff]  ;;  %v92_v16 = vld [vmem:[#allocation5 + $0x38] sm:$0xff]  ;;  %v586_v17 = vpack.c.bf16 %v187_v15, %v186_v12  ;;  %v188_v18 = vld [vmem:[#allocation7 + $0x20] sm:$0xff] }
  0x4f   :  { %571 = vmatprep.subr.bf16.mxu0 %v570_v5  ;;  %v189_v19 = vld [vmem:[#allocation7 + $0x28] sm:$0xff]  ;;  %v578_v21 = vpack.c.bf16 %v92_v16, %v91_v14  ;;  %v190_v22 = vld [vmem:[#allocation7 + $0x30] sm:$0xff]  ;;  %v191_v23 = vld [vmem:[#allocation7 + $0x38] sm:$0xff]  ;;  %p750_p7 = por %p749_p6, %p748_p5 }
  0x50   :  { %583 = vmatprep.subr.bf16.mxu1 %v582_v11  ;;  %v590_v20 = vpack.c.bf16 %v189_v19, %v188_v18  ;;  %v284_v24 = vld [vmem:[#allocation8] sm:$0xff]  ;;  %v285_v25 = vld [vmem:[#allocation8 + $0x8] sm:$0xff]  ;;  %v594_v26 = vpack.c.bf16 %v191_v23, %v190_v22  ;;  %v286_v30 = vld [vmem:[#allocation8 + $0x10] sm:$0xff] }
  0x51   :  { %585 = vmatpush3.bf16.msra.mxu1 %v582_v11  ;;  %v614_v27 = vpack.c.bf16 %v285_v25, %v284_v24  ;;  %v192_v28 = vld [vmem:[#allocation7 + $0x40] sm:$0xff]  ;;  %v193_v29 = vld [vmem:[#allocation7 + $0x48] sm:$0xff]  ;;  %v287_v31 = vld [vmem:[#allocation8 + $0x18] sm:$0xff]  ;;  %p751_p8 = pnand %p750_p7, %p744_p4 }
  0x52   :  { %573 = vmatpush3.bf16.msra.mxu0 %v570_v5  ;;  %587 = vmatprep.subr.bf16.mxu1 %v586_v17  ;;  %v84_v32 = vld [vmem:[#allocation2 + $0x8] sm:$0xff]  ;;  %v598_v33 = vpack.c.bf16 %v193_v29, %v192_v28  ;;  %v618_v34 = vpack.c.bf16 %v287_v31, %v286_v30  ;;  %v194_v35 = vld [vmem:[#allocation7 + $0x50] sm:$0xff]  ;;  %v288_v37 = vld [vmem:[#allocation8 + $0x20] sm:$0xff] }
  0x53   :  { %575 = vmatprep.subr.bf16.mxu0 %v574_v13  ;;  %v195_v36 = vld [vmem:[#allocation7 + $0x58] sm:$0xff]  ;;  %v289_v38 = vld [vmem:[#allocation8 + $0x28] sm:$0xff]  ;;  %v196_v41 = vld [vmem:[#allocation7 + $0x60] sm:$0xff] }
  0x54   :  { %v602_v39 = vpack.c.bf16 %v195_v36, %v194_v35  ;;  %v622_v40 = vpack.c.bf16 %v289_v38, %v288_v37  ;;  %v197_v42 = vld [vmem:[#allocation7 + $0x68] sm:$0xff]  ;;  %v290_v43 = vld [vmem:[#allocation8 + $0x30] sm:$0xff]  ;;  %v291_v44 = vld [vmem:[#allocation8 + $0x38] sm:$0xff] }
  0x55   :  { %589 = vmatpush3.bf16.msra.mxu1 %v586_v17  ;;  %v606_v45 = vpack.c.bf16 %v197_v42, %v196_v41  ;;  %v626_v46 = vpack.c.bf16 %v291_v44, %v290_v43  ;;  %v292_v47 = vld [vmem:[#allocation8 + $0x40] sm:$0xff]  ;;  %v293_v48 = vld [vmem:[#allocation8 + $0x48] sm:$0xff]  ;;  %v294_v50 = vld [vmem:[#allocation8 + $0x50] sm:$0xff] }
  0x56   :  { %577 = vmatpush3.bf16.msra.mxu0 %v574_v13  ;;  %591 = vmatprep.subr.bf16.mxu1 %v590_v20  ;;  %v630_v49 = vpack.c.bf16 %v293_v48, %v292_v47  ;;  %v295_v51 = vld [vmem:[#allocation8 + $0x58] sm:$0xff]  ;;  %v296_v53 = vld [vmem:[#allocation8 + $0x60] sm:$0xff]  ;;  %v297_v54 = vld [vmem:[#allocation8 + $0x68] sm:$0xff] }
  0x57   :  { %579 = vmatprep.subr.bf16.mxu0 %v578_v21  ;;  %v634_v52 = vpack.c.bf16 %v295_v51, %v294_v50  ;;  %v638_v55 = vpack.c.bf16 %v297_v54, %v296_v53  ;;  %v198_v56 = vld [vmem:[#allocation7 + $0x70] sm:$0xff]  ;;  %v199_v57 = vld [vmem:[#allocation7 + $0x78] sm:$0xff] }
  0x58   :  { %v298_v58 = vld [vmem:[#allocation8 + $0x70] sm:$0xff]  ;;  %v610_v59 = vpack.c.bf16 %v199_v57, %v198_v56  ;;  %v299_v60 = vld [vmem:[#allocation8 + $0x78] sm:$0xff] }
  0x59   :  { %593 = vmatpush3.bf16.msra.mxu1 %v590_v20  ;;  %v642_v61 = vpack.c.bf16 %v299_v60, %v298_v58  ;;  %v427_v62 = vld [vmem:[%s1009_s2] ss:$0 sm:$0xff] }
  0x5a   :  { %581 = vmatpush3.bf16.msra.mxu0 %v578_v21  ;;  %595 = vmatprep.subr.bf16.mxu1 %v594_v26 }
  0x5b   :  { %615 = vmatprep.subr.bf16.mxu0 %v614_v27 }
  0x5d   :  { %494 = vmatmul.mubr.msk.f32.vlgmr.msra.gmra.mrb[0].mxu0 %vm100_vm0, %v84_v32  ;;  %597 = vmatpush3.bf16.msra.mxu1 %v594_v26 }
  0x5e   :  { %617 = vmatpush3.bf16.msra.mxu0 %v614_v27  ;;  %599 = vmatprep.subr.bf16.mxu1 %v598_v33 }
  0x5f   :  { %619 = vmatprep.subr.bf16.mxu0 %v618_v34 }
  0x61   :  { %601 = vmatpush3.bf16.msra.mxu1 %v598_v33 }
  0x62   :  { %621 = vmatpush3.bf16.msra.mxu0 %v618_v34  ;;  %603 = vmatprep.subr.bf16.mxu1 %v602_v39 }
  0x63   :  { %623 = vmatprep.subr.bf16.mxu0 %v622_v40 }
  0x65   :  { %605 = vmatpush3.bf16.msra.mxu1 %v602_v39 }
  0x66   :  { %625 = vmatpush3.bf16.msra.mxu0 %v622_v40  ;;  %607 = vmatprep.subr.bf16.mxu1 %v606_v45 }
  0x67   :  { %627 = vmatprep.subr.bf16.mxu0 %v626_v46 }
  0x69   :  { %609 = vmatpush3.bf16.msra.mxu1 %v606_v45 }
  0x6a   :  { %629 = vmatpush3.bf16.msra.mxu0 %v626_v46  ;;  %611 = vmatprep.subr.bf16.mxu1 %v610_v59 }
  0x6b   :  { %631 = vmatprep.subr.bf16.mxu0 %v630_v49 }
  0x6d   :  { %613 = vmatpush3.bf16.msra.mxu1 %v610_v59 }
  0x6e   :  { %633 = vmatpush3.bf16.msra.mxu0 %v630_v49 }
  0x6f   :  { %635 = vmatprep.subr.bf16.mxu0 %v634_v52 }
  0x72   :  { %637 = vmatpush3.bf16.msra.mxu0 %v634_v52 }
  0x73   :  { %639 = vmatprep.subr.bf16.mxu0 %v638_v55 }
  0x76   :  { %641 = vmatpush3.bf16.msra.mxu0 %v638_v55 }
  0x77   :  { %643 = vmatprep.subr.bf16.mxu0 %v642_v61 }
  0x7a   :  { %645 = vmatpush3.bf16.msra.mxu0 %v642_v61 }
 0x130   :  { %v495_v63 = vpop.f32.mrb[0].mxu0 }
 0x131   :  { %v179_v0 = vadd.f32 %v495_v63, %v427_v62  ;;  %v173_v1 = vpop.f32.mrb[1].mxu0 }
 0x132   :  { %v174_v2 = vadd.f32 %v427_v62, %v173_v1 }
 0x133   :  { %183 = vst [vmem:[#allocation10 + $0x8] sm:$0xff] %v179_v0 }
 0x134   :  { %182 = vst [vmem:[#allocation10] sm:$0xff] %v174_v2  ;;  %528 = vmatprep.mubr.f32.mxu1 %v174_v2  ;;  %563 = vmatprep.mubr.f32.mxu0 %v174_v2 }
 0x135   :  { %529 = vmatmul.mubr.f32.vlgmr.msra.gmra.mrb[0].mxu1 %v179_v0  ;;  %564 = vmatmul.mubr.f32.vlgmr.msra.gmra.mrb[2].mxu0 %v179_v0 }
 0x136   :  { %754 = shalt.err (!%p751_p8)
}
 0x137   :  { %s755_s15 = scalar_lea.hbm %s1013_s6, 256 }
 0x138   :  { %p756_p9 = scmp.ne.s32.totalorder %s1013_s6, %s755_s15  ;;  %p759_p10 = scmp.lt.u32.totalorder %s755_s15, %s1013_s6 }
 0x13a   :  { %p761_p11 = pnand %p759_p10, %p756_p9 }
 0x13c   :  { %764 = shalt.err (!%p761_p11)
}
 0x13d   :  { %388 = dma.vmem_to_hbm [thread:$0]  %s383_s12, 256, %s1013_s6, [#allocation4], %s821_s17, %s821_s17, %s822_s18  }
 0x13e   :  { %v430_v3 = vld [vmem:[%s1012_s5] ss:$0 sm:$0xff]  ;;  %s826_s24 = smov [#allocation11]   ;;  %s827_s26 = smov [#allocation13]  }
 0x13f   :  { %s394_s25 = sshll.u32 %s826_s24, 4  ;;  %s406_s27 = sshll.u32 %s827_s26, 4  ;;  %s395_s25 = int_to_ptr.vmem [resolvable:$true] %s394_s25  ;;  %s970_s27 = int_to_ptr.vmem [resolvable:$true] %s406_s27 }
 0x140   :  { %s765_s6 = scalar_lea.vmem %s395_s25, 256  ;;  %p770_p13 = scmp.lt.s32.totalorder %s395_s25, %s395_s25 }
 0x141   :  { %p766_p12 = scmp.ne.s32.totalorder %s395_s25, %s765_s6  ;;  %p771_p0 = scmp.lt.s32.totalorder %s765_s6, %s765_s6 }
 0x143   :  { %p772_p1 = por %p771_p0, %p770_p13 }
 0x145   :  { %p773_p2 = pnand %p772_p1, %p766_p12 }
 0x208   :  { %v530_v4 = vpop.f32.mrb[0].mxu1  ;;  %v565_v5 = vpop.f32.mrb[2].mxu0 }
 0x209   :  { %v279_v6 = vadd.f32 %v530_v4, %v430_v3  ;;  %376 = vst [vmem:[#allocation13 + $0x8] sm:$0xff] %v565_v5  ;;  %v273_v7 = vpop.f32.mrb[1].mxu1  ;;  %v366_v8 = vpop.f32.mrb[3].mxu0 }
 0x20a   :  { %v274_v9 = vadd.f32 %v430_v3, %v273_v7  ;;  %375 = vst [vmem:[#allocation13] sm:$0xff] %v366_v8 }
 0x20b   :  { %283 = vst [vmem:[#allocation11 + $0x8] sm:$0xff] %v279_v6 }
 0x20c   :  { %282 = vst [vmem:[#allocation11] sm:$0xff] %v274_v9 }
 0x20d   :  { %776 = shalt.err (!%p773_p2)
}
 0x20e   :  { %s777_s1 = scalar_lea.hbm %s1014_s7, 256 }
 0x20f   :  { %p778_p3 = scmp.ne.s32.totalorder %s1014_s7, %s777_s1  ;;  %p781_p4 = scmp.lt.u32.totalorder %s777_s1, %s1014_s7 }
 0x211   :  { %p783_p5 = pnand %p781_p4, %p778_p3 }
 0x213   :  { %786 = shalt.err (!%p783_p5)
}
 0x214   :  { %400 = dma.vmem_to_hbm [thread:$0]  %s395_s25, 256, %s1014_s7, [#allocation12], %s821_s17, %s821_s17, %s822_s18  }
 0x215   :  { %s787_s12 = scalar_lea.vmem %s970_s27, 256  ;;  %p792_p7 = scmp.lt.s32.totalorder %s970_s27, %s970_s27 }
 0x216   :  { %p788_p6 = scmp.ne.s32.totalorder %s970_s27, %s787_s12  ;;  %p793_p8 = scmp.lt.s32.totalorder %s787_s12, %s787_s12 }
 0x218   :  { %p794_p9 = por %p793_p8, %p792_p7 }
 0x21a   :  { %p795_p10 = pnand %p794_p9, %p788_p6 }
 0x21c   :  { %798 = shalt.err (!%p795_p10)
}
 0x21d   :  { %s799_s14 = scalar_lea.hbm %s1015_s8, 256 }
 0x21e   :  { %p800_p11 = scmp.ne.s32.totalorder %s1015_s8, %s799_s14  ;;  %p803_p12 = scmp.lt.u32.totalorder %s799_s14, %s1015_s8 }
 0x220   :  { %p805_p13 = pnand %p803_p12, %p800_p11 }
 0x222   :  { %808 = shalt.err (!%p805_p13)
}
 0x223   :  { %412 = dma.vmem_to_hbm [thread:$0]  %s970_s27, 256, %s1015_s8, [#allocation12], %s821_s17, %s821_s17, %s822_s18  }
 0x224   :  { %815 = dma.done.wait [#allocation4], 256  }
 0x225   :  { %816 = vsyncadd [#allocation4], 4294967040 }
 0x226   :  { %817 = dma.done.wait [#allocation12], 512  }
 0x227   :  { %818 = vsyncadd [#allocation12], 4294966784 }
 0x228   :  { %422 = vsyncpa [#allocation3], 1 }
 0x229   :  { %423 = vsyncpa [#allocation6], 1 }
 0x22a   :  { %424 = vsyncpa [#allocation9], 1 }
 0x22b   :  { %425 = vsyncpa [#allocation4], 1 }
 0x22c   :  { %426 = vsyncpa [#allocation12], 1 }

</bundles_post_ra>
